<compile_context>
chip_gen: v5e
topology: v5e:2x2
jax: 0.10.0
libtpu: 0.0.40
codegen_flags: <defaults>
</compile_context>

<pallas_src>
import functools
import math

import jax
import jax.numpy as jnp
from jax.experimental import pallas as pl
from jax.experimental.pallas import tpu as pltpu  # noqa: F401  (kept for parity / future scratch use)


# -----------------------------------------------------------------------------
# Shared math helpers (usable both inside Pallas kernels and in the JAX reference)
# -----------------------------------------------------------------------------
def _gelu_exact(x):
    # Matches torch.nn.functional.gelu (erf-based, non-approximate).
    return 0.5 * x * (1.0 + jax.lax.erf(x * (1.0 / math.sqrt(2.0))))


def _layernorm(x, gamma, beta, eps=1e-5):
    mean = jnp.mean(x, axis=-1, keepdims=True)
    var = jnp.mean(jnp.square(x - mean), axis=-1, keepdims=True)
    inv = jax.lax.rsqrt(var + eps)
    return (x - mean) * inv * gamma + beta


# -----------------------------------------------------------------------------
# Fused Pallas kernel: ALL encoder layers (statically unrolled) + final norm + fc_out
# -----------------------------------------------------------------------------
def fused_forward_kernel(x_ref, wqkv_ref, wo_ref, w1_ref, w2_ref, vec_ref,
                         wout_ref, hvec_ref, o_ref, *, B, S, D, H, F, L):
    """Single invocation (no grid).  Everything is a whole-array VMEM block.

    x_ref:    (B*S, D)   embedded + positionally-encoded input.
    wqkv_ref: (L, D, 3D) fused Q/K/V weights, stacked over layers.
    wo_ref:   (L, D, D)  attention output projections.
    w1_ref:   (L, D, F)  FFN up projections.    w2_ref: (L, F, D) FFN down projections.
    vec_ref:  (L, 8, VW) packed per-layer vectors:
                         row0=bqkv(3D) row1=bo(D) row2=b1(F) row3=b2(D)
                         row4=ln1_g    row5=ln1_b row6=ln2_g row7=ln2_b
    wout_ref: (D, V)     fc_out weight.
    hvec_ref: (8, V)     row0=b_out(V) row1=final_ln_g(D) row2=final_ln_b(D)
    o_ref:    (B, V)     logits output.
    """
    hd = D // H
    scale = 1.0 / math.sqrt(hd)
    R = B * S

    x = x_ref[...]                                     # (R, D) f32, register-resident

    for l in range(L):                                 # static unroll over layers
        wqkv = wqkv_ref[l]                             # (D, 3D)
        wo = wo_ref[l]                                 # (D, D)
        w1 = w1_ref[l]                                 # (D, F)
        w2 = w2_ref[l]                                 # (F, D)
        vec = vec_ref[l]                               # (8, VW)

        bqkv = vec[0:1, 0:3 * D]
        bo = vec[1:2, 0:D]
        b1 = vec[2:3, 0:F]
        b2 = vec[3:4, 0:D]
        ln1g = vec[4:5, 0:D]
        ln1b = vec[5:6, 0:D]
        ln2g = vec[6:7, 0:D]
        ln2b = vec[7:8, 0:D]

        # fused QKV projection: (R, D) @ (D, 3D)
        qkv = jnp.dot(x, wqkv, preferred_element_type=jnp.float32) + bqkv
        q3 = qkv[:, 0:D].reshape(B, S, D)
        k3 = qkv[:, D:2 * D].reshape(B, S, D)
        v3 = qkv[:, 2 * D:3 * D].reshape(B, S, D)

        # per-head attention (batched over B); head-concat fused into Wo projection
        # via partial matmuls (no VMEM scratch, no lane concatenate).
        attn_proj = jnp.zeros((R, D), jnp.float32)
        for h in range(H):                             # static unroll (H small)
            c0, c1 = h * hd, (h + 1) * hd
            qh = q3[:, :, c0:c1]                       # (B, S, hd)
            kh = k3[:, :, c0:c1]
            vh = v3[:, :, c0:c1]
            s = jnp.einsum('bqd,bkd->bqk', qh, kh,
                           preferred_element_type=jnp.float32) * scale
            s = s - jnp.max(s, axis=-1, keepdims=True)
            p = jnp.exp(s)
            p = p / jnp.sum(p, axis=-1, keepdims=True)  # exact softmax denom
            oh = jnp.einsum('bqk,bkd->bqd', p, vh,
                            preferred_element_type=jnp.float32)
            attn_proj = attn_proj + jnp.dot(oh.reshape(R, hd), wo[c0:c1, :],
                                            preferred_element_type=jnp.float32)
        attn_proj = attn_proj + bo

        # post-norm (norm_first=False): h1 = LN1(x + attn)
        h1 = _layernorm(x + attn_proj, ln1g, ln1b)

        ff = jnp.dot(h1, w1, preferred_element_type=jnp.float32) + b1
        ff = _gelu_exact(ff)
        ff = jnp.dot(ff, w2, preferred_element_type=jnp.float32) + b2
        x = _layernorm(h1 + ff, ln2g, ln2b)            # carried in registers

    # ---- output head: final LayerNorm on last token, fc_out -----------------
    hv = hvec_ref[...]                                 # (8, V)
    b_out = hv[0:1, :]                                 # (1, V)
    lng = hv[1:2, 0:D]
    lnb = hv[2:3, 0:D]
    last = x.reshape(B, S, D)[:, S - 1:S, :].reshape(B, D)   # x[:, -1, :]
    normed = _layernorm(last, lng, lnb)                # final_norm (output_dropout = id)
    o_ref[...] = jnp.dot(normed, wout_ref[...],
                         preferred_element_type=jnp.float32) + b_out


# -----------------------------------------------------------------------------
# Parameters, packing, positional encoding, full forward
# -----------------------------------------------------------------------------
def sinusoidal_pe(max_len, d_model):
    position = jnp.arange(max_len, dtype=jnp.float32)[:, None]
    div_term = jnp.exp(jnp.arange(0, d_model, 2, dtype=jnp.float32)
                       * (-math.log(10000.0) / d_model))
    pe = jnp.zeros((max_len, d_model), jnp.float32)
    pe = pe.at[:, 0::2].set(jnp.sin(position * div_term))
    pe = pe.at[:, 1::2].set(jnp.cos(position * div_term))
    return pe


def init_params(key, cfg):
    V = cfg['vocab_size']
    E = cfg['embedding_dim']
    D = cfg['attention_d_model']
    Fd = D * cfg['ffn_dim_multiply']
    assert E == D, "embedding_dim == attention_d_model -> input_projection is Identity"
    assert D % cfg['attention_num_heads'] == 0

    keys = iter(jax.random.split(key, 128))

    def w(shape, scale=0.02):
        return (scale * jax.random.normal(next(keys), shape)).astype(jnp.float32)

    params = {
        'emb': w((V, E)),
        'layers': [],
        'final_ln_g': jnp.ones((1, D), jnp.float32),
        'final_ln_b': jnp.zeros((1, D), jnp.float32),
        'w_out': w((D, V)),
        'b_out': jnp.zeros((1, V), jnp.float32),
    }
    for _ in range(cfg['num_attention_layers']):
        params['layers'].append(dict(
            wq=w((D, D)), bq=jnp.zeros((1, D), jnp.float32),
            wk=w((D, D)), bk=jnp.zeros((1, D), jnp.float32),
            wv=w((D, D)), bv=jnp.zeros((1, D), jnp.float32),
            wo=w((D, D)), bo=jnp.zeros((1, D), jnp.float32),
            ln1g=jnp.ones((1, D), jnp.float32), ln1b=jnp.zeros((1, D), jnp.float32),
            w1=w((D, Fd)), b1=jnp.zeros((1, Fd), jnp.float32),
            w2=w((Fd, D)), b2=jnp.zeros((1, D), jnp.float32),
            ln2g=jnp.ones((1, D), jnp.float32), ln2b=jnp.zeros((1, D), jnp.float32),
        ))
    return params


def pack_params(params, cfg):
    """One-time packing: stack per-layer weights along a layer axis, pack the
    small bias/LayerNorm vectors into lane-dense tiles.  Done OUTSIDE the
    per-call path (not per forward)."""
    D = cfg['attention_d_model']
    F = D * cfg['ffn_dim_multiply']
    V = cfg['vocab_size']
    VW = ((max(3 * D, F) + 127) // 128) * 128   # lane-dense packed-vector width

    wqkv = jnp.stack([jnp.concatenate([Lp['wq'], Lp['wk'], Lp['wv']], axis=1)
                      for Lp in params['layers']])            # (L, D, 3D)
    wo = jnp.stack([Lp['wo'] for Lp in params['layers']])      # (L, D, D)
    w1 = jnp.stack([Lp['w1'] for Lp in params['layers']])      # (L, D, F)
    w2 = jnp.stack([Lp['w2'] for Lp in params['layers']])      # (L, F, D)

    vec_list = []
    for Lp in params['layers']:
        v = jnp.zeros((8, VW), jnp.float32)
        v = v.at[0, :3 * D].set(jnp.concatenate([Lp['bq'][0], Lp['bk'][0], Lp['bv'][0]]))
        v = v.at[1, :D].set(Lp['bo'][0])
        v = v.at[2, :F].set(Lp['b1'][0])
        v = v.at[3, :D].set(Lp['b2'][0])
        v = v.at[4, :D].set(Lp['ln1g'][0])
        v = v.at[5, :D].set(Lp['ln1b'][0])
        v = v.at[6, :D].set(Lp['ln2g'][0])
        v = v.at[7, :D].set(Lp['ln2b'][0])
        vec_list.append(v)
    vecs = jnp.stack(vec_list)                                 # (L, 8, VW)

    head_vecs = jnp.zeros((8, V), jnp.float32)
    head_vecs = head_vecs.at[0, :].set(params['b_out'][0])
    head_vecs = head_vecs.at[1, :D].set(params['final_ln_g'][0])
    head_vecs = head_vecs.at[2, :D].set(params['final_ln_b'][0])

    return dict(emb=params['emb'],
                pe=sinusoidal_pe(cfg['max_positional_encoding_len'], D),
                wqkv=wqkv, wo=wo, w1=w1, w2=w2, vecs=vecs,
                w_out=params['w_out'], head_vecs=head_vecs)


def make_forward(cfg):
    """Returns a jitted forward(packed, tokens) -> logits using one pallas_call."""
    D = cfg['attention_d_model']
    H = cfg['attention_num_heads']
    F = D * cfg['ffn_dim_multiply']
    V = cfg['vocab_size']
    L = cfg['num_attention_layers']

    @jax.jit
    def forward(packed, tokens):
        B, S = tokens.shape
        # glue: embedding gather + sinusoidal positional encoding (pe_dropout = identity)
        x = packed['emb'][tokens] + packed['pe'][None, :S, :]
        x = x.reshape(B * S, D).astype(jnp.float32)

        kernel = functools.partial(fused_forward_kernel,
                                   B=B, S=S, D=D, H=H, F=F, L=L)
        # No grid: every operand is a whole-array VMEM block; one kernel invocation.
        return pl.pallas_call(
            kernel,
            out_shape=jax.ShapeDtypeStruct((B, V), jnp.float32),
        )(x, packed['wqkv'], packed['wo'], packed['w1'], packed['w2'],
          packed['vecs'], packed['w_out'], packed['head_vecs'])

    return forward


# -----------------------------------------------------------------------------
# Pure-JAX reference (same math) for verification
# -----------------------------------------------------------------------------
def forward_reference(params, tokens, cfg):
    B, S = tokens.shape
    D = cfg['attention_d_model']
    H = cfg['attention_num_heads']
    hd = D // H
    x = params['emb'][tokens]
    pe = sinusoidal_pe(cfg['max_positional_encoding_len'], D)
    x = x + pe[None, :S, :]
    for Lp in params['layers']:
        q = x @ Lp['wq'] + Lp['bq']
        k = x @ Lp['wk'] + Lp['bk']
        v = x @ Lp['wv'] + Lp['bv']
        qh = q.reshape(B, S, H, hd)
        kh = k.reshape(B, S, H, hd)
        vh = v.reshape(B, S, H, hd)
        s = jnp.einsum('bqhd,bkhd->bhqk', qh, kh) / math.sqrt(hd)
        p = jax.nn.softmax(s, axis=-1)
        attn = jnp.einsum('bhqk,bkhd->bqhd', p, vh).reshape(B, S, D)
        attn = attn @ Lp['wo'] + Lp['bo']
        h1 = _layernorm(x + attn, Lp['ln1g'], Lp['ln1b'])
        ff = _gelu_exact(h1 @ Lp['w1'] + Lp['b1']) @ Lp['w2'] + Lp['b2']
        x = _layernorm(h1 + ff, Lp['ln2g'], Lp['ln2b'])
    last = x[:, -1, :]
    normed = _layernorm(last, params['final_ln_g'][0], params['final_ln_b'][0])
    return normed @ params['w_out'] + params['b_out']


# -----------------------------------------------------------------------------
# Main
# -----------------------------------------------------------------------------
if __name__ == "__main__":
    cfg = dict(
        vocab_size=256,
        embedding_dim=32,
        attention_d_model=32,
        attention_num_heads=4,
        num_attention_layers=2,
        ffn_dim_multiply=4,
        max_positional_encoding_len=64,
        use_parallel_stream_model=False,
        use_cnn_frontend=False,
        use_curved_ffn=False,
        transformer_norm_first=False,
    )

    key = jax.random.PRNGKey(0)
    k_params, k_tok = jax.random.split(key)
    params = init_params(k_params, cfg)

    B, S = 2, 8
    tokens = jax.random.randint(k_tok, (B, S), 0, cfg['vocab_size'], dtype=jnp.int32)

    packed = pack_params(params, cfg)         # one-time packing (outside per-call path)
    forward = make_forward(cfg)               # jitted: glue + single pallas_call

    logits = jax.block_until_ready(forward(packed, tokens))
    ref = jax.block_until_ready(forward_reference(params, tokens, cfg))

    assert logits.shape == (B, cfg['vocab_size']), logits.shape
    assert jnp.all(jnp.isfinite(logits))
    assert jnp.allclose(logits, ref, rtol=1e-2, atol=1e-2), \
        f"max abs err {jnp.max(jnp.abs(logits - ref))}"

    print("KERNEL_OK")
</pallas_src>

<mosaic_0001>
module attributes {stable_mosaic.version = 11 : i64} {
  func.func @fused_forward_kernel(%arg0: memref<16x32xf32, #tpu.memory_space<vmem>>, %arg1: memref<2x32x96xf32, #tpu.memory_space<vmem>>, %arg2: memref<2x32x32xf32, #tpu.memory_space<vmem>>, %arg3: memref<2x32x128xf32, #tpu.memory_space<vmem>>, %arg4: memref<2x128x32xf32, #tpu.memory_space<vmem>>, %arg5: memref<2x8x128xf32, #tpu.memory_space<vmem>>, %arg6: memref<32x256xf32, #tpu.memory_space<vmem>>, %arg7: memref<8x256xf32, #tpu.memory_space<vmem>>, %arg8: memref<2x256xf32, #tpu.memory_space<vmem>>) attributes {dimension_semantics = [], scalar_prefetch = 0 : i64, scratch_operands = 0 : i64, tpu.core_type = #tpu.core_type<tc>} {
    %c0 = arith.constant 0 : index
    %c0_0 = arith.constant 0 : index
    %0 = vector.load %arg0[%c0, %c0_0] : memref<16x32xf32, #tpu.memory_space<vmem>>, vector<16x32xf32>
    %c0_1 = arith.constant 0 : index
    %c0_2 = arith.constant 0 : index
    %c0_3 = arith.constant 0 : index
    %1 = vector.load %arg1[%c0_1, %c0_2, %c0_3] : memref<2x32x96xf32, #tpu.memory_space<vmem>>, vector<1x32x96xf32>
    %2 = vector.shape_cast %1 : vector<1x32x96xf32> to vector<32x96xf32>
    %c0_4 = arith.constant 0 : index
    %c0_5 = arith.constant 0 : index
    %c0_6 = arith.constant 0 : index
    %3 = vector.load %arg2[%c0_4, %c0_5, %c0_6] : memref<2x32x32xf32, #tpu.memory_space<vmem>>, vector<1x32x32xf32>
    %4 = vector.shape_cast %3 : vector<1x32x32xf32> to vector<32x32xf32>
    %c0_7 = arith.constant 0 : index
    %c0_8 = arith.constant 0 : index
    %c0_9 = arith.constant 0 : index
    %5 = vector.load %arg3[%c0_7, %c0_8, %c0_9] : memref<2x32x128xf32, #tpu.memory_space<vmem>>, vector<1x32x128xf32>
    %6 = vector.shape_cast %5 : vector<1x32x128xf32> to vector<32x128xf32>
    %c0_10 = arith.constant 0 : index
    %c0_11 = arith.constant 0 : index
    %c0_12 = arith.constant 0 : index
    %7 = vector.load %arg4[%c0_10, %c0_11, %c0_12] : memref<2x128x32xf32, #tpu.memory_space<vmem>>, vector<1x128x32xf32>
    %8 = vector.shape_cast %7 : vector<1x128x32xf32> to vector<128x32xf32>
    %c0_13 = arith.constant 0 : index
    %c0_14 = arith.constant 0 : index
    %c0_15 = arith.constant 0 : index
    %9 = vector.load %arg5[%c0_13, %c0_14, %c0_15] : memref<2x8x128xf32, #tpu.memory_space<vmem>>, vector<1x8x128xf32>
    %10 = vector.shape_cast %9 : vector<1x8x128xf32> to vector<8x128xf32>
    %11 = vector.extract_strided_slice %10 {offsets = [0, 0], sizes = [1, 96], strides = [1, 1]} : vector<8x128xf32> to vector<1x96xf32>
    %12 = vector.extract_strided_slice %10 {offsets = [1, 0], sizes = [1, 32], strides = [1, 1]} : vector<8x128xf32> to vector<1x32xf32>
    %13 = vector.extract_strided_slice %10 {offsets = [2, 0], sizes = [1, 128], strides = [1, 1]} : vector<8x128xf32> to vector<1x128xf32>
    %14 = vector.extract_strided_slice %10 {offsets = [3, 0], sizes = [1, 32], strides = [1, 1]} : vector<8x128xf32> to vector<1x32xf32>
    %15 = vector.extract_strided_slice %10 {offsets = [4, 0], sizes = [1, 32], strides = [1, 1]} : vector<8x128xf32> to vector<1x32xf32>
    %16 = vector.extract_strided_slice %10 {offsets = [5, 0], sizes = [1, 32], strides = [1, 1]} : vector<8x128xf32> to vector<1x32xf32>
    %17 = vector.extract_strided_slice %10 {offsets = [6, 0], sizes = [1, 32], strides = [1, 1]} : vector<8x128xf32> to vector<1x32xf32>
    %18 = vector.extract_strided_slice %10 {offsets = [7, 0], sizes = [1, 32], strides = [1, 1]} : vector<8x128xf32> to vector<1x32xf32>
    %cst = arith.constant dense<0.000000e+00> : vector<16x96xf32>
    %19 = tpu.matmul %0, %2, %cst {dimension_numbers = #tpu.dot_dimension_numbers<[1], [0], [0], [1], [0, 0, 1, 1], [], []>} : vector<16x32xf32>, vector<32x96xf32>, vector<16x96xf32> -> vector<16x96xf32>
    %20 = vector.broadcast %11 : vector<1x96xf32> to vector<16x96xf32>
    %21 = arith.addf %19, %20 : vector<16x96xf32>
    %22 = vector.extract_strided_slice %21 {offsets = [0, 0], sizes = [16, 32], strides = [1, 1]} : vector<16x96xf32> to vector<16x32xf32>
    %23 = vector.shape_cast %22 : vector<16x32xf32> to vector<2x8x32xf32>
    %24 = vector.extract_strided_slice %21 {offsets = [0, 32], sizes = [16, 32], strides = [1, 1]} : vector<16x96xf32> to vector<16x32xf32>
    %25 = vector.shape_cast %24 : vector<16x32xf32> to vector<2x8x32xf32>
    %26 = vector.extract_strided_slice %21 {offsets = [0, 64], sizes = [16, 32], strides = [1, 1]} : vector<16x96xf32> to vector<16x32xf32>
    %27 = vector.shape_cast %26 : vector<16x32xf32> to vector<2x8x32xf32>
    %cst_16 = arith.constant 0.000000e+00 : f32
    %28 = vector.broadcast %cst_16 : f32 to vector<16x32xf32>
    %29 = vector.extract_strided_slice %23 {offsets = [0, 0, 0], sizes = [2, 8, 8], strides = [1, 1, 1]} : vector<2x8x32xf32> to vector<2x8x8xf32>
    %30 = vector.extract_strided_slice %25 {offsets = [0, 0, 0], sizes = [2, 8, 8], strides = [1, 1, 1]} : vector<2x8x32xf32> to vector<2x8x8xf32>
    %31 = vector.extract_strided_slice %27 {offsets = [0, 0, 0], sizes = [2, 8, 8], strides = [1, 1, 1]} : vector<2x8x32xf32> to vector<2x8x8xf32>
    "tpu.trace_start"() <{level = 10 : i32, message = "bqd,bkd->bqk"}> : () -> ()
    %cst_17 = arith.constant dense<0.000000e+00> : vector<2x8x8xf32>
    %32 = tpu.matmul %29, %30, %cst_17 {dimension_numbers = #tpu.dot_dimension_numbers<[2], [2], [1], [1], [0, 0, 0, 1, 1, 1], [0], [0]>} : vector<2x8x8xf32>, vector<2x8x8xf32>, vector<2x8x8xf32> -> vector<2x8x8xf32>
    "tpu.trace_stop"() : () -> ()
    %cst_18 = arith.constant 0.353553385 : f32
    %33 = vector.broadcast %cst_18 : f32 to vector<2x8x8xf32>
    %34 = arith.mulf %32, %33 : vector<2x8x8xf32>
    %cst_19 = arith.constant dense<0xFF800000> : vector<2x8xf32>
    %35 = vector.multi_reduction <maximumf>, %34, %cst_19 [2] : vector<2x8x8xf32> to vector<2x8xf32>
    %36 = vector.shape_cast %35 : vector<2x8xf32> to vector<2x8x1xf32>
    %37 = vector.broadcast %36 : vector<2x8x1xf32> to vector<2x8x8xf32>
    %38 = arith.subf %34, %37 : vector<2x8x8xf32>
    %39 = math.exp %38 : vector<2x8x8xf32>
    %cst_20 = arith.constant dense<0.000000e+00> : vector<2x8xf32>
    %40 = vector.multi_reduction <add>, %39, %cst_20 [2] : vector<2x8x8xf32> to vector<2x8xf32>
    %41 = vector.shape_cast %40 : vector<2x8xf32> to vector<2x8x1xf32>
    %42 = vector.broadcast %41 : vector<2x8x1xf32> to vector<2x8x8xf32>
    %43 = arith.divf %39, %42 : vector<2x8x8xf32>
    "tpu.trace_start"() <{level = 10 : i32, message = "bqk,bkd->bqd"}> : () -> ()
    %cst_21 = arith.constant dense<0.000000e+00> : vector<2x8x8xf32>
    %44 = tpu.matmul %43, %31, %cst_21 {dimension_numbers = #tpu.dot_dimension_numbers<[2], [1], [1], [2], [0, 0, 0, 1, 1, 2], [0], [0]>} : vector<2x8x8xf32>, vector<2x8x8xf32>, vector<2x8x8xf32> -> vector<2x8x8xf32>
    "tpu.trace_stop"() : () -> ()
    %45 = vector.shape_cast %44 : vector<2x8x8xf32> to vector<16x8xf32>
    %46 = vector.extract_strided_slice %4 {offsets = [0, 0], sizes = [8, 32], strides = [1, 1]} : vector<32x32xf32> to vector<8x32xf32>
    %cst_22 = arith.constant dense<0.000000e+00> : vector<16x32xf32>
    %47 = tpu.matmul %45, %46, %cst_22 {dimension_numbers = #tpu.dot_dimension_numbers<[1], [0], [0], [1], [0, 0, 1, 1], [], []>} : vector<16x8xf32>, vector<8x32xf32>, vector<16x32xf32> -> vector<16x32xf32>
    %48 = arith.addf %28, %47 : vector<16x32xf32>
    %49 = vector.extract_strided_slice %23 {offsets = [0, 0, 8], sizes = [2, 8, 8], strides = [1, 1, 1]} : vector<2x8x32xf32> to vector<2x8x8xf32>
    %50 = vector.extract_strided_slice %25 {offsets = [0, 0, 8], sizes = [2, 8, 8], strides = [1, 1, 1]} : vector<2x8x32xf32> to vector<2x8x8xf32>
    %51 = vector.extract_strided_slice %27 {offsets = [0, 0, 8], sizes = [2, 8, 8], strides = [1, 1, 1]} : vector<2x8x32xf32> to vector<2x8x8xf32>
    "tpu.trace_start"() <{level = 10 : i32, message = "bqd,bkd->bqk"}> : () -> ()
    %cst_23 = arith.constant dense<0.000000e+00> : vector<2x8x8xf32>
    %52 = tpu.matmul %49, %50, %cst_23 {dimension_numbers = #tpu.dot_dimension_numbers<[2], [2], [1], [1], [0, 0, 0, 1, 1, 1], [0], [0]>} : vector<2x8x8xf32>, vector<2x8x8xf32>, vector<2x8x8xf32> -> vector<2x8x8xf32>
    "tpu.trace_stop"() : () -> ()
    %cst_24 = arith.constant 0.353553385 : f32
    %53 = vector.broadcast %cst_24 : f32 to vector<2x8x8xf32>
    %54 = arith.mulf %52, %53 : vector<2x8x8xf32>
    %cst_25 = arith.constant dense<0xFF800000> : vector<2x8xf32>
    %55 = vector.multi_reduction <maximumf>, %54, %cst_25 [2] : vector<2x8x8xf32> to vector<2x8xf32>
    %56 = vector.shape_cast %55 : vector<2x8xf32> to vector<2x8x1xf32>
    %57 = vector.broadcast %56 : vector<2x8x1xf32> to vector<2x8x8xf32>
    %58 = arith.subf %54, %57 : vector<2x8x8xf32>
    %59 = math.exp %58 : vector<2x8x8xf32>
    %cst_26 = arith.constant dense<0.000000e+00> : vector<2x8xf32>
    %60 = vector.multi_reduction <add>, %59, %cst_26 [2] : vector<2x8x8xf32> to vector<2x8xf32>
    %61 = vector.shape_cast %60 : vector<2x8xf32> to vector<2x8x1xf32>
    %62 = vector.broadcast %61 : vector<2x8x1xf32> to vector<2x8x8xf32>
    %63 = arith.divf %59, %62 : vector<2x8x8xf32>
    "tpu.trace_start"() <{level = 10 : i32, message = "bqk,bkd->bqd"}> : () -> ()
    %cst_27 = arith.constant dense<0.000000e+00> : vector<2x8x8xf32>
    %64 = tpu.matmul %63, %51, %cst_27 {dimension_numbers = #tpu.dot_dimension_numbers<[2], [1], [1], [2], [0, 0, 0, 1, 1, 2], [0], [0]>} : vector<2x8x8xf32>, vector<2x8x8xf32>, vector<2x8x8xf32> -> vector<2x8x8xf32>
    "tpu.trace_stop"() : () -> ()
    %65 = vector.shape_cast %64 : vector<2x8x8xf32> to vector<16x8xf32>
    %66 = vector.extract_strided_slice %4 {offsets = [8, 0], sizes = [8, 32], strides = [1, 1]} : vector<32x32xf32> to vector<8x32xf32>
    %cst_28 = arith.constant dense<0.000000e+00> : vector<16x32xf32>
    %67 = tpu.matmul %65, %66, %cst_28 {dimension_numbers = #tpu.dot_dimension_numbers<[1], [0], [0], [1], [0, 0, 1, 1], [], []>} : vector<16x8xf32>, vector<8x32xf32>, vector<16x32xf32> -> vector<16x32xf32>
    %68 = arith.addf %48, %67 : vector<16x32xf32>
    %69 = vector.extract_strided_slice %23 {offsets = [0, 0, 16], sizes = [2, 8, 8], strides = [1, 1, 1]} : vector<2x8x32xf32> to vector<2x8x8xf32>
    %70 = vector.extract_strided_slice %25 {offsets = [0, 0, 16], sizes = [2, 8, 8], strides = [1, 1, 1]} : vector<2x8x32xf32> to vector<2x8x8xf32>
    %71 = vector.extract_strided_slice %27 {offsets = [0, 0, 16], sizes = [2, 8, 8], strides = [1, 1, 1]} : vector<2x8x32xf32> to vector<2x8x8xf32>
    "tpu.trace_start"() <{level = 10 : i32, message = "bqd,bkd->bqk"}> : () -> ()
    %cst_29 = arith.constant dense<0.000000e+00> : vector<2x8x8xf32>
    %72 = tpu.matmul %69, %70, %cst_29 {dimension_numbers = #tpu.dot_dimension_numbers<[2], [2], [1], [1], [0, 0, 0, 1, 1, 1], [0], [0]>} : vector<2x8x8xf32>, vector<2x8x8xf32>, vector<2x8x8xf32> -> vector<2x8x8xf32>
    "tpu.trace_stop"() : () -> ()
    %cst_30 = arith.constant 0.353553385 : f32
    %73 = vector.broadcast %cst_30 : f32 to vector<2x8x8xf32>
    %74 = arith.mulf %72, %73 : vector<2x8x8xf32>
    %cst_31 = arith.constant dense<0xFF800000> : vector<2x8xf32>
    %75 = vector.multi_reduction <maximumf>, %74, %cst_31 [2] : vector<2x8x8xf32> to vector<2x8xf32>
    %76 = vector.shape_cast %75 : vector<2x8xf32> to vector<2x8x1xf32>
    %77 = vector.broadcast %76 : vector<2x8x1xf32> to vector<2x8x8xf32>
    %78 = arith.subf %74, %77 : vector<2x8x8xf32>
    %79 = math.exp %78 : vector<2x8x8xf32>
    %cst_32 = arith.constant dense<0.000000e+00> : vector<2x8xf32>
    %80 = vector.multi_reduction <add>, %79, %cst_32 [2] : vector<2x8x8xf32> to vector<2x8xf32>
    %81 = vector.shape_cast %80 : vector<2x8xf32> to vector<2x8x1xf32>
    %82 = vector.broadcast %81 : vector<2x8x1xf32> to vector<2x8x8xf32>
    %83 = arith.divf %79, %82 : vector<2x8x8xf32>
    "tpu.trace_start"() <{level = 10 : i32, message = "bqk,bkd->bqd"}> : () -> ()
    %cst_33 = arith.constant dense<0.000000e+00> : vector<2x8x8xf32>
    %84 = tpu.matmul %83, %71, %cst_33 {dimension_numbers = #tpu.dot_dimension_numbers<[2], [1], [1], [2], [0, 0, 0, 1, 1, 2], [0], [0]>} : vector<2x8x8xf32>, vector<2x8x8xf32>, vector<2x8x8xf32> -> vector<2x8x8xf32>
    "tpu.trace_stop"() : () -> ()
    %85 = vector.shape_cast %84 : vector<2x8x8xf32> to vector<16x8xf32>
    %86 = vector.extract_strided_slice %4 {offsets = [16, 0], sizes = [8, 32], strides = [1, 1]} : vector<32x32xf32> to vector<8x32xf32>
    %cst_34 = arith.constant dense<0.000000e+00> : vector<16x32xf32>
    %87 = tpu.matmul %85, %86, %cst_34 {dimension_numbers = #tpu.dot_dimension_numbers<[1], [0], [0], [1], [0, 0, 1, 1], [], []>} : vector<16x8xf32>, vector<8x32xf32>, vector<16x32xf32> -> vector<16x32xf32>
    %88 = arith.addf %68, %87 : vector<16x32xf32>
    %89 = vector.extract_strided_slice %23 {offsets = [0, 0, 24], sizes = [2, 8, 8], strides = [1, 1, 1]} : vector<2x8x32xf32> to vector<2x8x8xf32>
    %90 = vector.extract_strided_slice %25 {offsets = [0, 0, 24], sizes = [2, 8, 8], strides = [1, 1, 1]} : vector<2x8x32xf32> to vector<2x8x8xf32>
    %91 = vector.extract_strided_slice %27 {offsets = [0, 0, 24], sizes = [2, 8, 8], strides = [1, 1, 1]} : vector<2x8x32xf32> to vector<2x8x8xf32>
    "tpu.trace_start"() <{level = 10 : i32, message = "bqd,bkd->bqk"}> : () -> ()
    %cst_35 = arith.constant dense<0.000000e+00> : vector<2x8x8xf32>
    %92 = tpu.matmul %89, %90, %cst_35 {dimension_numbers = #tpu.dot_dimension_numbers<[2], [2], [1], [1], [0, 0, 0, 1, 1, 1], [0], [0]>} : vector<2x8x8xf32>, vector<2x8x8xf32>, vector<2x8x8xf32> -> vector<2x8x8xf32>
    "tpu.trace_stop"() : () -> ()
    %cst_36 = arith.constant 0.353553385 : f32
    %93 = vector.broadcast %cst_36 : f32 to vector<2x8x8xf32>
    %94 = arith.mulf %92, %93 : vector<2x8x8xf32>
    %cst_37 = arith.constant dense<0xFF800000> : vector<2x8xf32>
    %95 = vector.multi_reduction <maximumf>, %94, %cst_37 [2] : vector<2x8x8xf32> to vector<2x8xf32>
    %96 = vector.shape_cast %95 : vector<2x8xf32> to vector<2x8x1xf32>
    %97 = vector.broadcast %96 : vector<2x8x1xf32> to vector<2x8x8xf32>
    %98 = arith.subf %94, %97 : vector<2x8x8xf32>
    %99 = math.exp %98 : vector<2x8x8xf32>
    %cst_38 = arith.constant dense<0.000000e+00> : vector<2x8xf32>
    %100 = vector.multi_reduction <add>, %99, %cst_38 [2] : vector<2x8x8xf32> to vector<2x8xf32>
    %101 = vector.shape_cast %100 : vector<2x8xf32> to vector<2x8x1xf32>
    %102 = vector.broadcast %101 : vector<2x8x1xf32> to vector<2x8x8xf32>
    %103 = arith.divf %99, %102 : vector<2x8x8xf32>
    "tpu.trace_start"() <{level = 10 : i32, message = "bqk,bkd->bqd"}> : () -> ()
    %cst_39 = arith.constant dense<0.000000e+00> : vector<2x8x8xf32>
    %104 = tpu.matmul %103, %91, %cst_39 {dimension_numbers = #tpu.dot_dimension_numbers<[2], [1], [1], [2], [0, 0, 0, 1, 1, 2], [0], [0]>} : vector<2x8x8xf32>, vector<2x8x8xf32>, vector<2x8x8xf32> -> vector<2x8x8xf32>
    "tpu.trace_stop"() : () -> ()
    %105 = vector.shape_cast %104 : vector<2x8x8xf32> to vector<16x8xf32>
    %106 = vector.extract_strided_slice %4 {offsets = [24, 0], sizes = [8, 32], strides = [1, 1]} : vector<32x32xf32> to vector<8x32xf32>
    %cst_40 = arith.constant dense<0.000000e+00> : vector<16x32xf32>
    %107 = tpu.matmul %105, %106, %cst_40 {dimension_numbers = #tpu.dot_dimension_numbers<[1], [0], [0], [1], [0, 0, 1, 1], [], []>} : vector<16x8xf32>, vector<8x32xf32>, vector<16x32xf32> -> vector<16x32xf32>
    %108 = arith.addf %88, %107 : vector<16x32xf32>
    %109 = vector.broadcast %12 : vector<1x32xf32> to vector<16x32xf32>
    %110 = arith.addf %108, %109 : vector<16x32xf32>
    %111 = arith.addf %0, %110 : vector<16x32xf32>
    %cst_41 = arith.constant dense<0.000000e+00> : vector<16xf32>
    %112 = vector.multi_reduction <add>, %111, %cst_41 [1] : vector<16x32xf32> to vector<16xf32>
    %113 = vector.shape_cast %112 : vector<16xf32> to vector<16x1xf32>
    %cst_42 = arith.constant 3.200000e+01 : f32
    %114 = vector.broadcast %cst_42 : f32 to vector<16x1xf32>
    %115 = arith.divf %113, %114 : vector<16x1xf32>
    %116 = vector.broadcast %115 : vector<16x1xf32> to vector<16x32xf32>
    %117 = arith.subf %111, %116 : vector<16x32xf32>
    %118 = arith.mulf %117, %117 : vector<16x32xf32>
    %cst_43 = arith.constant dense<0.000000e+00> : vector<16xf32>
    %119 = vector.multi_reduction <add>, %118, %cst_43 [1] : vector<16x32xf32> to vector<16xf32>
    %120 = vector.shape_cast %119 : vector<16xf32> to vector<16x1xf32>
    %cst_44 = arith.constant 3.200000e+01 : f32
    %121 = vector.broadcast %cst_44 : f32 to vector<16x1xf32>
    %122 = arith.divf %120, %121 : vector<16x1xf32>
    %cst_45 = arith.constant 9.99999974E-6 : f32
    %123 = vector.broadcast %cst_45 : f32 to vector<16x1xf32>
    %124 = arith.addf %122, %123 : vector<16x1xf32>
    %125 = math.rsqrt %124 : vector<16x1xf32>
    %126 = vector.broadcast %115 : vector<16x1xf32> to vector<16x32xf32>
    %127 = arith.subf %111, %126 : vector<16x32xf32>
    %128 = vector.broadcast %125 : vector<16x1xf32> to vector<16x32xf32>
    %129 = arith.mulf %127, %128 : vector<16x32xf32>
    %130 = vector.broadcast %15 : vector<1x32xf32> to vector<16x32xf32>
    %131 = arith.mulf %129, %130 : vector<16x32xf32>
    %132 = vector.broadcast %16 : vector<1x32xf32> to vector<16x32xf32>
    %133 = arith.addf %131, %132 : vector<16x32xf32>
    %cst_46 = arith.constant dense<0.000000e+00> : vector<16x128xf32>
    %134 = tpu.matmul %133, %6, %cst_46 {dimension_numbers = #tpu.dot_dimension_numbers<[1], [0], [0], [1], [0, 0, 1, 1], [], []>} : vector<16x32xf32>, vector<32x128xf32>, vector<16x128xf32> -> vector<16x128xf32>
    %135 = vector.broadcast %13 : vector<1x128xf32> to vector<16x128xf32>
    %136 = arith.addf %134, %135 : vector<16x128xf32>
    %cst_47 = arith.constant 5.000000e-01 : f32
    %137 = vector.broadcast %cst_47 : f32 to vector<16x128xf32>
    %138 = arith.mulf %137, %136 : vector<16x128xf32>
    %cst_48 = arith.constant 0.707106769 : f32
    %139 = vector.broadcast %cst_48 : f32 to vector<16x128xf32>
    %140 = arith.mulf %136, %139 : vector<16x128xf32>
    %141 = math.erf %140 : vector<16x128xf32>
    %cst_49 = arith.constant 1.000000e+00 : f32
    %142 = vector.broadcast %cst_49 : f32 to vector<16x128xf32>
    %143 = arith.addf %142, %141 : vector<16x128xf32>
    %144 = arith.mulf %138, %143 : vector<16x128xf32>
    %cst_50 = arith.constant dense<0.000000e+00> : vector<16x32xf32>
    %145 = tpu.matmul %144, %8, %cst_50 {dimension_numbers = #tpu.dot_dimension_numbers<[1], [0], [0], [1], [0, 0, 1, 1], [], []>} : vector<16x128xf32>, vector<128x32xf32>, vector<16x32xf32> -> vector<16x32xf32>
    %146 = vector.broadcast %14 : vector<1x32xf32> to vector<16x32xf32>
    %147 = arith.addf %145, %146 : vector<16x32xf32>
    %148 = arith.addf %133, %147 : vector<16x32xf32>
    %cst_51 = arith.constant dense<0.000000e+00> : vector<16xf32>
    %149 = vector.multi_reduction <add>, %148, %cst_51 [1] : vector<16x32xf32> to vector<16xf32>
    %150 = vector.shape_cast %149 : vector<16xf32> to vector<16x1xf32>
    %cst_52 = arith.constant 3.200000e+01 : f32
    %151 = vector.broadcast %cst_52 : f32 to vector<16x1xf32>
    %152 = arith.divf %150, %151 : vector<16x1xf32>
    %153 = vector.broadcast %152 : vector<16x1xf32> to vector<16x32xf32>
    %154 = arith.subf %148, %153 : vector<16x32xf32>
    %155 = arith.mulf %154, %154 : vector<16x32xf32>
    %cst_53 = arith.constant dense<0.000000e+00> : vector<16xf32>
    %156 = vector.multi_reduction <add>, %155, %cst_53 [1] : vector<16x32xf32> to vector<16xf32>
    %157 = vector.shape_cast %156 : vector<16xf32> to vector<16x1xf32>
    %cst_54 = arith.constant 3.200000e+01 : f32
    %158 = vector.broadcast %cst_54 : f32 to vector<16x1xf32>
    %159 = arith.divf %157, %158 : vector<16x1xf32>
    %cst_55 = arith.constant 9.99999974E-6 : f32
    %160 = vector.broadcast %cst_55 : f32 to vector<16x1xf32>
    %161 = arith.addf %159, %160 : vector<16x1xf32>
    %162 = math.rsqrt %161 : vector<16x1xf32>
    %163 = vector.broadcast %152 : vector<16x1xf32> to vector<16x32xf32>
    %164 = arith.subf %148, %163 : vector<16x32xf32>
    %165 = vector.broadcast %162 : vector<16x1xf32> to vector<16x32xf32>
    %166 = arith.mulf %164, %165 : vector<16x32xf32>
    %167 = vector.broadcast %17 : vector<1x32xf32> to vector<16x32xf32>
    %168 = arith.mulf %166, %167 : vector<16x32xf32>
    %169 = vector.broadcast %18 : vector<1x32xf32> to vector<16x32xf32>
    %170 = arith.addf %168, %169 : vector<16x32xf32>
    %c1 = arith.constant 1 : index
    %c0_56 = arith.constant 0 : index
    %c0_57 = arith.constant 0 : index
    %171 = vector.load %arg1[%c1, %c0_56, %c0_57] : memref<2x32x96xf32, #tpu.memory_space<vmem>>, vector<1x32x96xf32>
    %172 = vector.shape_cast %171 : vector<1x32x96xf32> to vector<32x96xf32>
    %c1_58 = arith.constant 1 : index
    %c0_59 = arith.constant 0 : index
    %c0_60 = arith.constant 0 : index
    %173 = vector.load %arg2[%c1_58, %c0_59, %c0_60] : memref<2x32x32xf32, #tpu.memory_space<vmem>>, vector<1x32x32xf32>
    %174 = vector.shape_cast %173 : vector<1x32x32xf32> to vector<32x32xf32>
    %c1_61 = arith.constant 1 : index
    %c0_62 = arith.constant 0 : index
    %c0_63 = arith.constant 0 : index
    %175 = vector.load %arg3[%c1_61, %c0_62, %c0_63] : memref<2x32x128xf32, #tpu.memory_space<vmem>>, vector<1x32x128xf32>
    %176 = vector.shape_cast %175 : vector<1x32x128xf32> to vector<32x128xf32>
    %c1_64 = arith.constant 1 : index
    %c0_65 = arith.constant 0 : index
    %c0_66 = arith.constant 0 : index
    %177 = vector.load %arg4[%c1_64, %c0_65, %c0_66] : memref<2x128x32xf32, #tpu.memory_space<vmem>>, vector<1x128x32xf32>
    %178 = vector.shape_cast %177 : vector<1x128x32xf32> to vector<128x32xf32>
    %c1_67 = arith.constant 1 : index
    %c0_68 = arith.constant 0 : index
    %c0_69 = arith.constant 0 : index
    %179 = vector.load %arg5[%c1_67, %c0_68, %c0_69] : memref<2x8x128xf32, #tpu.memory_space<vmem>>, vector<1x8x128xf32>
    %180 = vector.shape_cast %179 : vector<1x8x128xf32> to vector<8x128xf32>
    %181 = vector.extract_strided_slice %180 {offsets = [0, 0], sizes = [1, 96], strides = [1, 1]} : vector<8x128xf32> to vector<1x96xf32>
    %182 = vector.extract_strided_slice %180 {offsets = [1, 0], sizes = [1, 32], strides = [1, 1]} : vector<8x128xf32> to vector<1x32xf32>
    %183 = vector.extract_strided_slice %180 {offsets = [2, 0], sizes = [1, 128], strides = [1, 1]} : vector<8x128xf32> to vector<1x128xf32>
    %184 = vector.extract_strided_slice %180 {offsets = [3, 0], sizes = [1, 32], strides = [1, 1]} : vector<8x128xf32> to vector<1x32xf32>
    %185 = vector.extract_strided_slice %180 {offsets = [4, 0], sizes = [1, 32], strides = [1, 1]} : vector<8x128xf32> to vector<1x32xf32>
    %186 = vector.extract_strided_slice %180 {offsets = [5, 0], sizes = [1, 32], strides = [1, 1]} : vector<8x128xf32> to vector<1x32xf32>
    %187 = vector.extract_strided_slice %180 {offsets = [6, 0], sizes = [1, 32], strides = [1, 1]} : vector<8x128xf32> to vector<1x32xf32>
    %188 = vector.extract_strided_slice %180 {offsets = [7, 0], sizes = [1, 32], strides = [1, 1]} : vector<8x128xf32> to vector<1x32xf32>
    %cst_70 = arith.constant dense<0.000000e+00> : vector<16x96xf32>
    %189 = tpu.matmul %170, %172, %cst_70 {dimension_numbers = #tpu.dot_dimension_numbers<[1], [0], [0], [1], [0, 0, 1, 1], [], []>} : vector<16x32xf32>, vector<32x96xf32>, vector<16x96xf32> -> vector<16x96xf32>
    %190 = vector.broadcast %181 : vector<1x96xf32> to vector<16x96xf32>
    %191 = arith.addf %189, %190 : vector<16x96xf32>
    %192 = vector.extract_strided_slice %191 {offsets = [0, 0], sizes = [16, 32], strides = [1, 1]} : vector<16x96xf32> to vector<16x32xf32>
    %193 = vector.shape_cast %192 : vector<16x32xf32> to vector<2x8x32xf32>
    %194 = vector.extract_strided_slice %191 {offsets = [0, 32], sizes = [16, 32], strides = [1, 1]} : vector<16x96xf32> to vector<16x32xf32>
    %195 = vector.shape_cast %194 : vector<16x32xf32> to vector<2x8x32xf32>
    %196 = vector.extract_strided_slice %191 {offsets = [0, 64], sizes = [16, 32], strides = [1, 1]} : vector<16x96xf32> to vector<16x32xf32>
    %197 = vector.shape_cast %196 : vector<16x32xf32> to vector<2x8x32xf32>
    %cst_71 = arith.constant 0.000000e+00 : f32
    %198 = vector.broadcast %cst_71 : f32 to vector<16x32xf32>
    %199 = vector.extract_strided_slice %193 {offsets = [0, 0, 0], sizes = [2, 8, 8], strides = [1, 1, 1]} : vector<2x8x32xf32> to vector<2x8x8xf32>
    %200 = vector.extract_strided_slice %195 {offsets = [0, 0, 0], sizes = [2, 8, 8], strides = [1, 1, 1]} : vector<2x8x32xf32> to vector<2x8x8xf32>
    %201 = vector.extract_strided_slice %197 {offsets = [0, 0, 0], sizes = [2, 8, 8], strides = [1, 1, 1]} : vector<2x8x32xf32> to vector<2x8x8xf32>
    "tpu.trace_start"() <{level = 10 : i32, message = "bqd,bkd->bqk"}> : () -> ()
    %cst_72 = arith.constant dense<0.000000e+00> : vector<2x8x8xf32>
    %202 = tpu.matmul %199, %200, %cst_72 {dimension_numbers = #tpu.dot_dimension_numbers<[2], [2], [1], [1], [0, 0, 0, 1, 1, 1], [0], [0]>} : vector<2x8x8xf32>, vector<2x8x8xf32>, vector<2x8x8xf32> -> vector<2x8x8xf32>
    "tpu.trace_stop"() : () -> ()
    %cst_73 = arith.constant 0.353553385 : f32
    %203 = vector.broadcast %cst_73 : f32 to vector<2x8x8xf32>
    %204 = arith.mulf %202, %203 : vector<2x8x8xf32>
    %cst_74 = arith.constant dense<0xFF800000> : vector<2x8xf32>
    %205 = vector.multi_reduction <maximumf>, %204, %cst_74 [2] : vector<2x8x8xf32> to vector<2x8xf32>
    %206 = vector.shape_cast %205 : vector<2x8xf32> to vector<2x8x1xf32>
    %207 = vector.broadcast %206 : vector<2x8x1xf32> to vector<2x8x8xf32>
    %208 = arith.subf %204, %207 : vector<2x8x8xf32>
    %209 = math.exp %208 : vector<2x8x8xf32>
    %cst_75 = arith.constant dense<0.000000e+00> : vector<2x8xf32>
    %210 = vector.multi_reduction <add>, %209, %cst_75 [2] : vector<2x8x8xf32> to vector<2x8xf32>
    %211 = vector.shape_cast %210 : vector<2x8xf32> to vector<2x8x1xf32>
    %212 = vector.broadcast %211 : vector<2x8x1xf32> to vector<2x8x8xf32>
    %213 = arith.divf %209, %212 : vector<2x8x8xf32>
    "tpu.trace_start"() <{level = 10 : i32, message = "bqk,bkd->bqd"}> : () -> ()
    %cst_76 = arith.constant dense<0.000000e+00> : vector<2x8x8xf32>
    %214 = tpu.matmul %213, %201, %cst_76 {dimension_numbers = #tpu.dot_dimension_numbers<[2], [1], [1], [2], [0, 0, 0, 1, 1, 2], [0], [0]>} : vector<2x8x8xf32>, vector<2x8x8xf32>, vector<2x8x8xf32> -> vector<2x8x8xf32>
    "tpu.trace_stop"() : () -> ()
    %215 = vector.shape_cast %214 : vector<2x8x8xf32> to vector<16x8xf32>
    %216 = vector.extract_strided_slice %174 {offsets = [0, 0], sizes = [8, 32], strides = [1, 1]} : vector<32x32xf32> to vector<8x32xf32>
    %cst_77 = arith.constant dense<0.000000e+00> : vector<16x32xf32>
    %217 = tpu.matmul %215, %216, %cst_77 {dimension_numbers = #tpu.dot_dimension_numbers<[1], [0], [0], [1], [0, 0, 1, 1], [], []>} : vector<16x8xf32>, vector<8x32xf32>, vector<16x32xf32> -> vector<16x32xf32>
    %218 = arith.addf %198, %217 : vector<16x32xf32>
    %219 = vector.extract_strided_slice %193 {offsets = [0, 0, 8], sizes = [2, 8, 8], strides = [1, 1, 1]} : vector<2x8x32xf32> to vector<2x8x8xf32>
    %220 = vector.extract_strided_slice %195 {offsets = [0, 0, 8], sizes = [2, 8, 8], strides = [1, 1, 1]} : vector<2x8x32xf32> to vector<2x8x8xf32>
    %221 = vector.extract_strided_slice %197 {offsets = [0, 0, 8], sizes = [2, 8, 8], strides = [1, 1, 1]} : vector<2x8x32xf32> to vector<2x8x8xf32>
    "tpu.trace_start"() <{level = 10 : i32, message = "bqd,bkd->bqk"}> : () -> ()
    %cst_78 = arith.constant dense<0.000000e+00> : vector<2x8x8xf32>
    %222 = tpu.matmul %219, %220, %cst_78 {dimension_numbers = #tpu.dot_dimension_numbers<[2], [2], [1], [1], [0, 0, 0, 1, 1, 1], [0], [0]>} : vector<2x8x8xf32>, vector<2x8x8xf32>, vector<2x8x8xf32> -> vector<2x8x8xf32>
    "tpu.trace_stop"() : () -> ()
    %cst_79 = arith.constant 0.353553385 : f32
    %223 = vector.broadcast %cst_79 : f32 to vector<2x8x8xf32>
    %224 = arith.mulf %222, %223 : vector<2x8x8xf32>
    %cst_80 = arith.constant dense<0xFF800000> : vector<2x8xf32>
    %225 = vector.multi_reduction <maximumf>, %224, %cst_80 [2] : vector<2x8x8xf32> to vector<2x8xf32>
    %226 = vector.shape_cast %225 : vector<2x8xf32> to vector<2x8x1xf32>
    %227 = vector.broadcast %226 : vector<2x8x1xf32> to vector<2x8x8xf32>
    %228 = arith.subf %224, %227 : vector<2x8x8xf32>
    %229 = math.exp %228 : vector<2x8x8xf32>
    %cst_81 = arith.constant dense<0.000000e+00> : vector<2x8xf32>
    %230 = vector.multi_reduction <add>, %229, %cst_81 [2] : vector<2x8x8xf32> to vector<2x8xf32>
    %231 = vector.shape_cast %230 : vector<2x8xf32> to vector<2x8x1xf32>
    %232 = vector.broadcast %231 : vector<2x8x1xf32> to vector<2x8x8xf32>
    %233 = arith.divf %229, %232 : vector<2x8x8xf32>
    "tpu.trace_start"() <{level = 10 : i32, message = "bqk,bkd->bqd"}> : () -> ()
    %cst_82 = arith.constant dense<0.000000e+00> : vector<2x8x8xf32>
    %234 = tpu.matmul %233, %221, %cst_82 {dimension_numbers = #tpu.dot_dimension_numbers<[2], [1], [1], [2], [0, 0, 0, 1, 1, 2], [0], [0]>} : vector<2x8x8xf32>, vector<2x8x8xf32>, vector<2x8x8xf32> -> vector<2x8x8xf32>
    "tpu.trace_stop"() : () -> ()
    %235 = vector.shape_cast %234 : vector<2x8x8xf32> to vector<16x8xf32>
    %236 = vector.extract_strided_slice %174 {offsets = [8, 0], sizes = [8, 32], strides = [1, 1]} : vector<32x32xf32> to vector<8x32xf32>
    %cst_83 = arith.constant dense<0.000000e+00> : vector<16x32xf32>
    %237 = tpu.matmul %235, %236, %cst_83 {dimension_numbers = #tpu.dot_dimension_numbers<[1], [0], [0], [1], [0, 0, 1, 1], [], []>} : vector<16x8xf32>, vector<8x32xf32>, vector<16x32xf32> -> vector<16x32xf32>
    %238 = arith.addf %218, %237 : vector<16x32xf32>
    %239 = vector.extract_strided_slice %193 {offsets = [0, 0, 16], sizes = [2, 8, 8], strides = [1, 1, 1]} : vector<2x8x32xf32> to vector<2x8x8xf32>
    %240 = vector.extract_strided_slice %195 {offsets = [0, 0, 16], sizes = [2, 8, 8], strides = [1, 1, 1]} : vector<2x8x32xf32> to vector<2x8x8xf32>
    %241 = vector.extract_strided_slice %197 {offsets = [0, 0, 16], sizes = [2, 8, 8], strides = [1, 1, 1]} : vector<2x8x32xf32> to vector<2x8x8xf32>
    "tpu.trace_start"() <{level = 10 : i32, message = "bqd,bkd->bqk"}> : () -> ()
    %cst_84 = arith.constant dense<0.000000e+00> : vector<2x8x8xf32>
    %242 = tpu.matmul %239, %240, %cst_84 {dimension_numbers = #tpu.dot_dimension_numbers<[2], [2], [1], [1], [0, 0, 0, 1, 1, 1], [0], [0]>} : vector<2x8x8xf32>, vector<2x8x8xf32>, vector<2x8x8xf32> -> vector<2x8x8xf32>
    "tpu.trace_stop"() : () -> ()
    %cst_85 = arith.constant 0.353553385 : f32
    %243 = vector.broadcast %cst_85 : f32 to vector<2x8x8xf32>
    %244 = arith.mulf %242, %243 : vector<2x8x8xf32>
    %cst_86 = arith.constant dense<0xFF800000> : vector<2x8xf32>
    %245 = vector.multi_reduction <maximumf>, %244, %cst_86 [2] : vector<2x8x8xf32> to vector<2x8xf32>
    %246 = vector.shape_cast %245 : vector<2x8xf32> to vector<2x8x1xf32>
    %247 = vector.broadcast %246 : vector<2x8x1xf32> to vector<2x8x8xf32>
    %248 = arith.subf %244, %247 : vector<2x8x8xf32>
    %249 = math.exp %248 : vector<2x8x8xf32>
    %cst_87 = arith.constant dense<0.000000e+00> : vector<2x8xf32>
    %250 = vector.multi_reduction <add>, %249, %cst_87 [2] : vector<2x8x8xf32> to vector<2x8xf32>
    %251 = vector.shape_cast %250 : vector<2x8xf32> to vector<2x8x1xf32>
    %252 = vector.broadcast %251 : vector<2x8x1xf32> to vector<2x8x8xf32>
    %253 = arith.divf %249, %252 : vector<2x8x8xf32>
    "tpu.trace_start"() <{level = 10 : i32, message = "bqk,bkd->bqd"}> : () -> ()
    %cst_88 = arith.constant dense<0.000000e+00> : vector<2x8x8xf32>
    %254 = tpu.matmul %253, %241, %cst_88 {dimension_numbers = #tpu.dot_dimension_numbers<[2], [1], [1], [2], [0, 0, 0, 1, 1, 2], [0], [0]>} : vector<2x8x8xf32>, vector<2x8x8xf32>, vector<2x8x8xf32> -> vector<2x8x8xf32>
    "tpu.trace_stop"() : () -> ()
    %255 = vector.shape_cast %254 : vector<2x8x8xf32> to vector<16x8xf32>
    %256 = vector.extract_strided_slice %174 {offsets = [16, 0], sizes = [8, 32], strides = [1, 1]} : vector<32x32xf32> to vector<8x32xf32>
    %cst_89 = arith.constant dense<0.000000e+00> : vector<16x32xf32>
    %257 = tpu.matmul %255, %256, %cst_89 {dimension_numbers = #tpu.dot_dimension_numbers<[1], [0], [0], [1], [0, 0, 1, 1], [], []>} : vector<16x8xf32>, vector<8x32xf32>, vector<16x32xf32> -> vector<16x32xf32>
    %258 = arith.addf %238, %257 : vector<16x32xf32>
    %259 = vector.extract_strided_slice %193 {offsets = [0, 0, 24], sizes = [2, 8, 8], strides = [1, 1, 1]} : vector<2x8x32xf32> to vector<2x8x8xf32>
    %260 = vector.extract_strided_slice %195 {offsets = [0, 0, 24], sizes = [2, 8, 8], strides = [1, 1, 1]} : vector<2x8x32xf32> to vector<2x8x8xf32>
    %261 = vector.extract_strided_slice %197 {offsets = [0, 0, 24], sizes = [2, 8, 8], strides = [1, 1, 1]} : vector<2x8x32xf32> to vector<2x8x8xf32>
    "tpu.trace_start"() <{level = 10 : i32, message = "bqd,bkd->bqk"}> : () -> ()
    %cst_90 = arith.constant dense<0.000000e+00> : vector<2x8x8xf32>
    %262 = tpu.matmul %259, %260, %cst_90 {dimension_numbers = #tpu.dot_dimension_numbers<[2], [2], [1], [1], [0, 0, 0, 1, 1, 1], [0], [0]>} : vector<2x8x8xf32>, vector<2x8x8xf32>, vector<2x8x8xf32> -> vector<2x8x8xf32>
    "tpu.trace_stop"() : () -> ()
    %cst_91 = arith.constant 0.353553385 : f32
    %263 = vector.broadcast %cst_91 : f32 to vector<2x8x8xf32>
    %264 = arith.mulf %262, %263 : vector<2x8x8xf32>
    %cst_92 = arith.constant dense<0xFF800000> : vector<2x8xf32>
    %265 = vector.multi_reduction <maximumf>, %264, %cst_92 [2] : vector<2x8x8xf32> to vector<2x8xf32>
    %266 = vector.shape_cast %265 : vector<2x8xf32> to vector<2x8x1xf32>
    %267 = vector.broadcast %266 : vector<2x8x1xf32> to vector<2x8x8xf32>
    %268 = arith.subf %264, %267 : vector<2x8x8xf32>
    %269 = math.exp %268 : vector<2x8x8xf32>
    %cst_93 = arith.constant dense<0.000000e+00> : vector<2x8xf32>
    %270 = vector.multi_reduction <add>, %269, %cst_93 [2] : vector<2x8x8xf32> to vector<2x8xf32>
    %271 = vector.shape_cast %270 : vector<2x8xf32> to vector<2x8x1xf32>
    %272 = vector.broadcast %271 : vector<2x8x1xf32> to vector<2x8x8xf32>
    %273 = arith.divf %269, %272 : vector<2x8x8xf32>
    "tpu.trace_start"() <{level = 10 : i32, message = "bqk,bkd->bqd"}> : () -> ()
    %cst_94 = arith.constant dense<0.000000e+00> : vector<2x8x8xf32>
    %274 = tpu.matmul %273, %261, %cst_94 {dimension_numbers = #tpu.dot_dimension_numbers<[2], [1], [1], [2], [0, 0, 0, 1, 1, 2], [0], [0]>} : vector<2x8x8xf32>, vector<2x8x8xf32>, vector<2x8x8xf32> -> vector<2x8x8xf32>
    "tpu.trace_stop"() : () -> ()
    %275 = vector.shape_cast %274 : vector<2x8x8xf32> to vector<16x8xf32>
    %276 = vector.extract_strided_slice %174 {offsets = [24, 0], sizes = [8, 32], strides = [1, 1]} : vector<32x32xf32> to vector<8x32xf32>
    %cst_95 = arith.constant dense<0.000000e+00> : vector<16x32xf32>
    %277 = tpu.matmul %275, %276, %cst_95 {dimension_numbers = #tpu.dot_dimension_numbers<[1], [0], [0], [1], [0, 0, 1, 1], [], []>} : vector<16x8xf32>, vector<8x32xf32>, vector<16x32xf32> -> vector<16x32xf32>
    %278 = arith.addf %258, %277 : vector<16x32xf32>
    %279 = vector.broadcast %182 : vector<1x32xf32> to vector<16x32xf32>
    %280 = arith.addf %278, %279 : vector<16x32xf32>
    %281 = arith.addf %170, %280 : vector<16x32xf32>
    %cst_96 = arith.constant dense<0.000000e+00> : vector<16xf32>
    %282 = vector.multi_reduction <add>, %281, %cst_96 [1] : vector<16x32xf32> to vector<16xf32>
    %283 = vector.shape_cast %282 : vector<16xf32> to vector<16x1xf32>
    %cst_97 = arith.constant 3.200000e+01 : f32
    %284 = vector.broadcast %cst_97 : f32 to vector<16x1xf32>
    %285 = arith.divf %283, %284 : vector<16x1xf32>
    %286 = vector.broadcast %285 : vector<16x1xf32> to vector<16x32xf32>
    %287 = arith.subf %281, %286 : vector<16x32xf32>
    %288 = arith.mulf %287, %287 : vector<16x32xf32>
    %cst_98 = arith.constant dense<0.000000e+00> : vector<16xf32>
    %289 = vector.multi_reduction <add>, %288, %cst_98 [1] : vector<16x32xf32> to vector<16xf32>
    %290 = vector.shape_cast %289 : vector<16xf32> to vector<16x1xf32>
    %cst_99 = arith.constant 3.200000e+01 : f32
    %291 = vector.broadcast %cst_99 : f32 to vector<16x1xf32>
    %292 = arith.divf %290, %291 : vector<16x1xf32>
    %cst_100 = arith.constant 9.99999974E-6 : f32
    %293 = vector.broadcast %cst_100 : f32 to vector<16x1xf32>
    %294 = arith.addf %292, %293 : vector<16x1xf32>
    %295 = math.rsqrt %294 : vector<16x1xf32>
    %296 = vector.broadcast %285 : vector<16x1xf32> to vector<16x32xf32>
    %297 = arith.subf %281, %296 : vector<16x32xf32>
    %298 = vector.broadcast %295 : vector<16x1xf32> to vector<16x32xf32>
    %299 = arith.mulf %297, %298 : vector<16x32xf32>
    %300 = vector.broadcast %185 : vector<1x32xf32> to vector<16x32xf32>
    %301 = arith.mulf %299, %300 : vector<16x32xf32>
    %302 = vector.broadcast %186 : vector<1x32xf32> to vector<16x32xf32>
    %303 = arith.addf %301, %302 : vector<16x32xf32>
    %cst_101 = arith.constant dense<0.000000e+00> : vector<16x128xf32>
    %304 = tpu.matmul %303, %176, %cst_101 {dimension_numbers = #tpu.dot_dimension_numbers<[1], [0], [0], [1], [0, 0, 1, 1], [], []>} : vector<16x32xf32>, vector<32x128xf32>, vector<16x128xf32> -> vector<16x128xf32>
    %305 = vector.broadcast %183 : vector<1x128xf32> to vector<16x128xf32>
    %306 = arith.addf %304, %305 : vector<16x128xf32>
    %cst_102 = arith.constant 5.000000e-01 : f32
    %307 = vector.broadcast %cst_102 : f32 to vector<16x128xf32>
    %308 = arith.mulf %307, %306 : vector<16x128xf32>
    %cst_103 = arith.constant 0.707106769 : f32
    %309 = vector.broadcast %cst_103 : f32 to vector<16x128xf32>
    %310 = arith.mulf %306, %309 : vector<16x128xf32>
    %311 = math.erf %310 : vector<16x128xf32>
    %cst_104 = arith.constant 1.000000e+00 : f32
    %312 = vector.broadcast %cst_104 : f32 to vector<16x128xf32>
    %313 = arith.addf %312, %311 : vector<16x128xf32>
    %314 = arith.mulf %308, %313 : vector<16x128xf32>
    %cst_105 = arith.constant dense<0.000000e+00> : vector<16x32xf32>
    %315 = tpu.matmul %314, %178, %cst_105 {dimension_numbers = #tpu.dot_dimension_numbers<[1], [0], [0], [1], [0, 0, 1, 1], [], []>} : vector<16x128xf32>, vector<128x32xf32>, vector<16x32xf32> -> vector<16x32xf32>
    %316 = vector.broadcast %184 : vector<1x32xf32> to vector<16x32xf32>
    %317 = arith.addf %315, %316 : vector<16x32xf32>
    %318 = arith.addf %303, %317 : vector<16x32xf32>
    %cst_106 = arith.constant dense<0.000000e+00> : vector<16xf32>
    %319 = vector.multi_reduction <add>, %318, %cst_106 [1] : vector<16x32xf32> to vector<16xf32>
    %320 = vector.shape_cast %319 : vector<16xf32> to vector<16x1xf32>
    %cst_107 = arith.constant 3.200000e+01 : f32
    %321 = vector.broadcast %cst_107 : f32 to vector<16x1xf32>
    %322 = arith.divf %320, %321 : vector<16x1xf32>
    %323 = vector.broadcast %322 : vector<16x1xf32> to vector<16x32xf32>
    %324 = arith.subf %318, %323 : vector<16x32xf32>
    %325 = arith.mulf %324, %324 : vector<16x32xf32>
    %cst_108 = arith.constant dense<0.000000e+00> : vector<16xf32>
    %326 = vector.multi_reduction <add>, %325, %cst_108 [1] : vector<16x32xf32> to vector<16xf32>
    %327 = vector.shape_cast %326 : vector<16xf32> to vector<16x1xf32>
    %cst_109 = arith.constant 3.200000e+01 : f32
    %328 = vector.broadcast %cst_109 : f32 to vector<16x1xf32>
    %329 = arith.divf %327, %328 : vector<16x1xf32>
    %cst_110 = arith.constant 9.99999974E-6 : f32
    %330 = vector.broadcast %cst_110 : f32 to vector<16x1xf32>
    %331 = arith.addf %329, %330 : vector<16x1xf32>
    %332 = math.rsqrt %331 : vector<16x1xf32>
    %333 = vector.broadcast %322 : vector<16x1xf32> to vector<16x32xf32>
    %334 = arith.subf %318, %333 : vector<16x32xf32>
    %335 = vector.broadcast %332 : vector<16x1xf32> to vector<16x32xf32>
    %336 = arith.mulf %334, %335 : vector<16x32xf32>
    %337 = vector.broadcast %187 : vector<1x32xf32> to vector<16x32xf32>
    %338 = arith.mulf %336, %337 : vector<16x32xf32>
    %339 = vector.broadcast %188 : vector<1x32xf32> to vector<16x32xf32>
    %340 = arith.addf %338, %339 : vector<16x32xf32>
    %c0_111 = arith.constant 0 : index
    %c0_112 = arith.constant 0 : index
    %341 = vector.load %arg7[%c0_111, %c0_112] : memref<8x256xf32, #tpu.memory_space<vmem>>, vector<8x256xf32>
    %342 = vector.extract_strided_slice %341 {offsets = [0, 0], sizes = [1, 256], strides = [1, 1]} : vector<8x256xf32> to vector<1x256xf32>
    %343 = vector.extract_strided_slice %341 {offsets = [1, 0], sizes = [1, 32], strides = [1, 1]} : vector<8x256xf32> to vector<1x32xf32>
    %344 = vector.extract_strided_slice %341 {offsets = [2, 0], sizes = [1, 32], strides = [1, 1]} : vector<8x256xf32> to vector<1x32xf32>
    %345 = vector.shape_cast %340 : vector<16x32xf32> to vector<2x8x32xf32>
    %346 = vector.extract_strided_slice %345 {offsets = [0, 7, 0], sizes = [2, 1, 32], strides = [1, 1, 1]} : vector<2x8x32xf32> to vector<2x1x32xf32>
    %347 = vector.shape_cast %346 : vector<2x1x32xf32> to vector<2x32xf32>
    %cst_113 = arith.constant dense<0.000000e+00> : vector<2xf32>
    %348 = vector.multi_reduction <add>, %347, %cst_113 [1] : vector<2x32xf32> to vector<2xf32>
    %349 = vector.shape_cast %348 : vector<2xf32> to vector<2x1xf32>
    %cst_114 = arith.constant 3.200000e+01 : f32
    %350 = vector.broadcast %cst_114 : f32 to vector<2x1xf32>
    %351 = arith.divf %349, %350 : vector<2x1xf32>
    %352 = vector.broadcast %351 : vector<2x1xf32> to vector<2x32xf32>
    %353 = arith.subf %347, %352 : vector<2x32xf32>
    %354 = arith.mulf %353, %353 : vector<2x32xf32>
    %cst_115 = arith.constant dense<0.000000e+00> : vector<2xf32>
    %355 = vector.multi_reduction <add>, %354, %cst_115 [1] : vector<2x32xf32> to vector<2xf32>
    %356 = vector.shape_cast %355 : vector<2xf32> to vector<2x1xf32>
    %cst_116 = arith.constant 3.200000e+01 : f32
    %357 = vector.broadcast %cst_116 : f32 to vector<2x1xf32>
    %358 = arith.divf %356, %357 : vector<2x1xf32>
    %cst_117 = arith.constant 9.99999974E-6 : f32
    %359 = vector.broadcast %cst_117 : f32 to vector<2x1xf32>
    %360 = arith.addf %358, %359 : vector<2x1xf32>
    %361 = math.rsqrt %360 : vector<2x1xf32>
    %362 = vector.broadcast %351 : vector<2x1xf32> to vector<2x32xf32>
    %363 = arith.subf %347, %362 : vector<2x32xf32>
    %364 = vector.broadcast %361 : vector<2x1xf32> to vector<2x32xf32>
    %365 = arith.mulf %363, %364 : vector<2x32xf32>
    %366 = vector.broadcast %343 : vector<1x32xf32> to vector<2x32xf32>
    %367 = arith.mulf %365, %366 : vector<2x32xf32>
    %368 = vector.broadcast %344 : vector<1x32xf32> to vector<2x32xf32>
    %369 = arith.addf %367, %368 : vector<2x32xf32>
    %c0_118 = arith.constant 0 : index
    %c0_119 = arith.constant 0 : index
    %370 = vector.load %arg6[%c0_118, %c0_119] : memref<32x256xf32, #tpu.memory_space<vmem>>, vector<32x256xf32>
    %cst_120 = arith.constant dense<0.000000e+00> : vector<2x256xf32>
    %371 = tpu.matmul %369, %370, %cst_120 {dimension_numbers = #tpu.dot_dimension_numbers<[1], [0], [0], [1], [0, 0, 1, 1], [], []>} : vector<2x32xf32>, vector<32x256xf32>, vector<2x256xf32> -> vector<2x256xf32>
    %372 = vector.broadcast %342 : vector<1x256xf32> to vector<2x256xf32>
    %373 = arith.addf %371, %372 : vector<2x256xf32>
    %c0_121 = arith.constant 0 : index
    %c0_122 = arith.constant 0 : index
    %374 = vector.load %arg8[%c0_121, %c0_122] : memref<2x256xf32, #tpu.memory_space<vmem>>, vector<2x256xf32>
    tpu.vector_store %arg8[%c0_121, %c0_122], %373 {strides = array<i32>} : memref<2x256xf32, #tpu.memory_space<vmem>>, vector<2x256xf32>,
    return
  }
}

</mosaic_0001>

<bundles_post_ra>
// kernel: forward.1
= control target key start
LH: loop header
LB: loop body
LE: loop exit
PB: predicated region body
PF: predicated region fallthrough
CT: control target
= control target key end

     0   :  { %s3180_s0 = inlined_call_operand.vmem [shape: f32[16,32], index: 0, kind: input, shape index: {}]   ;;  %s3181_s1 = inlined_call_operand.vmem [shape: f32[2,32,96], index: 1, kind: input, shape index: {}]   ;;  %s3182_s2 = inlined_call_operand.vmem [shape: f32[2,32,32], index: 2, kind: input, shape index: {}]   ;;  %s3183_s3 = inlined_call_operand.vmem [shape: f32[2,32,128], index: 3, kind: input, shape index: {}]   ;;  %s3184_s4 = inlined_call_operand.vmem [shape: f32[2,128,32], index: 4, kind: input, shape index: {}]   ;;  %s3185_s5 = inlined_call_operand.vmem [shape: f32[2,8,128], index: 5, kind: input, shape index: {}]   ;;  %s3186_s6 = inlined_call_operand.vmem [shape: f32[32,256], index: 6, kind: input, shape index: {}]   ;;  %s3187_s7 = inlined_call_operand.vmem [shape: f32[8,256], index: 7, kind: input, shape index: {}]   ;;  %s3188_s8 = inlined_call_operand.hbm [shape: f32[2,256], index: 8, kind: output, shape index: {}]  }
   0x1   :  { %v35_v0 = vld [vmem:[%s3181_s1 + $0x18] sm:$0xff]  ;;  %v34_v1 = vld [vmem:[%s3181_s1 + $0x10] sm:$0xff]  ;;  %v33_v2 = vld [vmem:[%s3181_s1 + $0x8] sm:$0xff] }
   0x2   :  { %81 = vmatpush.msra.mxu0 %v35_v0 }
   0x3   :  { %13 = vsyncpa [#allocation3], 0  ;;  %v32_v3 = vld [vmem:[%s3181_s1] sm:$0xff]  ;;  %vm62_vm0 = vcmask 261120   ;;  %v2644_v5 = vld [vmem:[%s3180_s0 + $0x8] sm:$0xff]  ;;  %s2564_s19 = smov 88  }
   0x4   :  { %82 = vmatpush.msra.mxu0 %v34_v1  ;;  %v2637_v4 = vld [vmem:[%s3180_s0] sm:$0xff]  ;;  %s2565_s20 = smov 96   ;;  %s2566_s0 = smov 120   ;;  %vm95_vm1 = vcmask 64512  }
   0x5   :  { %v2651_v6 = vld [vmem:[%s3185_s5] sm:$0xff]  ;;  %s2567_s21 = smov 64   ;;  %s2568_s22 = smov 112  }
   0x6   :  { %83 = vmatpush.msra.mxu0 %v33_v2  ;;  %v61_v7 = vperm.slane %v2651_v6, 0  ;;  %s2569_s23 = smov 56   ;;  %s2570_s24 = smov 80  }
   0x7   :  { %s2571_s29 = smov 72   ;;  %s2572_s30 = smov 104  }
   0x8   :  { %84 = vmatpush.msra.mxu0 %v32_v3  ;;  %s2573_s9 = smov 48   ;;  %s2574_s12 = smov 40  }
   0x9   :  { %2317 = vmatmul.msk.f32.vlgmr.msra.gmra.mxu0 %vm62_vm0, %v2637_v4  ;;  %s2576_s27 = smov [#allocation2]   ;;  %s2308_s11 = sshll.u32 %s3188_s8, 4  ;;  %s2309_s11 = int_to_ptr.hbm [resolvable:$true] %s2308_s11 }
  0x11   :  { %2318 = vmatmul.msk.f32.gmra.mxu0 %vm62_vm0, %v2644_v5 }
  0x86   :  { %v86_v8 = vpop.f32.mrf.mxu0 }
  0x87   :  { %v2654_v9 = vadd.f32 %v86_v8, %v61_v7 }
  0x89   :  { %251 = vrot.lane.b32.xlu1 %v2654_v9, %s2564_s19  ;;  %93 = vrot.lane.b32.xlu0 %v2654_v9, %s2565_s20 }
  0x8e   :  { %v89_v10 = vpop.f32.mrf.mxu0 }
  0x8f   :  { %v2660_v11 = vadd.f32 %v89_v10, %v61_v7 }
  0x91   :  { %249 = vrot.lane.b32.xlu1 %v2654_v9, %s2566_s0  ;;  %121 = vrot.lane.b32.xlu0 %v2660_v11, %s2565_s20 }
  0xfb   :  { %v252_v12 = vpop.permute.xlu1 %251  ;;  %v94_v13 = vpop.permute.xlu0 %93 }
  0xfc   :  { %2319 = vmatpush.xpose.msk.msra.mxu1 %vm95_vm1, %v94_v13 }
  0xff   :  { %2320 = vmatmul.msk.f32.vlgmr.msra.gmra.mxu1 %vm95_vm1, %v2654_v9 }
 0x100   :  { %2325 = vmatpush.xpose.msk.msrb.mxu1 %vm95_vm1, %v252_v12 }
 0x103   :  { %v122_v14 = vpop.permute.xlu0 %121  ;;  %v250_v15 = vpop.permute.xlu1 %249 }
 0x104   :  { %2321 = vmatpush.xpose.msk.msra.mxu3 %vm95_vm1, %v122_v14 }
 0x107   :  { %2322 = vmatmul.msk.f32.vlgmr.msra.gmra.mxu3 %vm95_vm1, %v2660_v11  ;;  %2326 = vmatmul.msk.f32.vlgmr.msrb.gmra.mxu1 %vm95_vm1, %v250_v15 }
 0x17c   :  { %v117_v16 = vpop.f32.mrf.mxu1 }
 0x17d   :  { %v147_v17 = vmul.f32 0.35355338, %v117_v16 }
 0x17f   :  { %v149_v18 = vsel %vm95_vm1, %v147_v17, -inf }
 0x180   :  { %150 = vmax.xlane.f32.xlu2 %v149_v18 }
 0x184   :  { %v274_v19 = vpop.f32.mrf.mxu1 }
 0x185   :  { %v305_v20 = vmul.f32 0.35355338, %v274_v19 }
 0x187   :  { %v307_v21 = vsel %vm95_vm1, %v305_v20, -inf }
 0x188   :  { %308 = vmax.xlane.f32.xlu0 %v307_v21 }
 0x18a   :  { %v144_v22 = vpop.f32.mrf.mxu3 }
 0x18b   :  { %v148_v23 = vmul.f32 0.35355338, %v144_v22 }
 0x18d   :  { %v152_v24 = vsel %vm95_vm1, %v148_v23, -inf }
 0x198   :  { %197 = vrot.lane.b32.xlu2 %v2654_v9, %s2567_s21 }
 0x19c   :  { %279 = vrot.lane.b32.xlu0 %v2660_v11, %s2564_s19 }
 0x1a0   :  { %223 = vrot.lane.b32.xlu2 %v2660_v11, %s2567_s21 }
 0x1a4   :  { %465 = vrot.lane.b32.xlu0 %v2654_v9, %s2568_s22 }
 0x1c9   :  { %153 = vmax.xlane.f32.xlu2 %v152_v24  ;;  %v36_v24 = vld [vmem:[%s3182_s2] sm:$0xff] }
 0x1ca   :  { %457 = vmatpush.msrb.mxu0 %v36_v24 }
 0x1e1   :  { %355 = vrot.lane.b32.xlu2 %v2654_v9, %s2569_s23 }
 0x1f3   :  { %v151_v25 = vpop.xlane.xlu2 %150 }
 0x1f4   :  { %v155_v26 = vsub.f32 %v147_v17, %v151_v25 }
 0x1f6   :  { %v157_v27 = vmul.f32 1.442695, %v155_v26 }
 0x1f8   :  { %2442 = vpow2.f32 %v157_v27 }
 0x1fb   :  { %v198_v28 = vpop.permute.xlu2 %197  ;;  %v309_v29 = vpop.xlane.xlu0 %308 }
 0x1fc   :  { %v313_v30 = vsub.f32 %v305_v20, %v309_v29  ;;  %218 = vmatpush.msrb.mxu3 %v198_v28  ;;  %v37_v29 = vld [vmem:[%s3182_s2 + $0x8] sm:$0xff] }
 0x1fe   :  { %v2443_v31 = vpop.eup %2442  ;;  %v315_v32 = vmul.f32 1.442695, %v313_v30 }
 0x1ff   :  { %v161_v33 = vsel %vm95_vm1, %v2443_v31, 0.0 }
 0x200   :  { %2444 = vpow2.f32 %v315_v32  ;;  %162 = vadd.xlane.f32.xlu1 %v161_v33 }
 0x203   :  { %v224_v34 = vpop.permute.xlu2 %223 }
 0x204   :  { %244 = vmatpush.msra.mxu3 %v224_v34 }
 0x206   :  { %v2688_v35 = vpop.eup %2444 }
 0x207   :  { %v319_v36 = vsel %vm95_vm1, %v2688_v35, 0.0 }
 0x20a   :  { %320 = vadd.xlane.f32.xlu2 %v319_v36 }
 0x20e   :  { %v280_v37 = vpop.permute.xlu0 %279 }
 0x20f   :  { %2327 = vmatpush.xpose.msk.msra.mxu2 %vm95_vm1, %v280_v37 }
 0x213   :  { %428 = vmatpush.msrb.mxu2 %v37_v29 }
 0x219   :  { %277 = vrot.lane.b32.xlu1 %v2660_v11, %s2566_s0 }
 0x23c   :  { %v154_v38 = vpop.xlane.xlu2 %153 }
 0x23d   :  { %v156_v39 = vsub.f32 %v148_v23, %v154_v38  ;;  %v466_v23 = vpop.permute.xlu0 %465 }
 0x23f   :  { %v159_v40 = vmul.f32 1.442695, %v156_v39 }
 0x241   :  { %2446 = vpow2.f32 %v159_v40 }
 0x244   :  { %v356_v55 = vpop.permute.xlu2 %355 }
 0x247   :  { %v2447_v41 = vpop.eup %2446 }
 0x248   :  { %v164_v42 = vsel %vm95_vm1, %v2447_v41, 0.0 }
 0x249   :  { %165 = vadd.xlane.f32.xlu2 %v164_v42 }
 0x261   :  { %467 = vrot.lane.b32.xlu2 %v2654_v9, %s2570_s24 }
 0x273   :  { %v163_v43 = vpop.xlane.xlu1 %162 }
 0x274   :  { %2448 = vrcp.f32 %v163_v43  ;;  %v178_v47 = vand.u32 2147483648, %v163_v43  ;;  %v176_v49 = vand.u32 2147483647, %v163_v43  ;;  %vm172_vm3 = vweird.f32 %v163_v43 }
 0x276   :  { %v179_v51 = vor.u32 1.1754944e-38, %v178_v47  ;;  %vm177_vm5 = vcmp.eq.f32.partialorder %v176_v49, 8.507059e+37 }
 0x27a   :  { %v2449_v44 = vpop.eup %2448 }
 0x27b   :  { %v168_v45 = vmul.f32 %v2449_v44, %v163_v43  ;;  %vm173_vm2 = vweird.f32 %v2449_v44 }
 0x27c   :  { %vm174_vm4 = vmor %vm172_vm3, %vm173_vm2 }
 0x27d   :  { %v169_v46 = vsub.f32 1.0, %v168_v45  ;;  %v321_v57 = vpop.xlane.xlu2 %320 }
 0x27e   :  { %2450 = vrcp.f32 %v321_v57  ;;  %v336_v14 = vand.u32 2147483648, %v321_v57  ;;  %vm330_vm11 = vweird.f32 %v321_v57  ;;  %v334_v16 = vand.u32 2147483647, %v321_v57 }
 0x27f   :  { %v170_v48 = vmul.f32 %v2449_v44, %v169_v46 }
 0x280   :  { %v337_v20 = vor.u32 1.1754944e-38, %v336_v14  ;;  %vm335_vm13 = vcmp.eq.f32.partialorder %v334_v16, 8.507059e+37 }
 0x281   :  { %v171_v50 = vadd.f32 %v2449_v44, %v170_v48 }
 0x283   :  { %v175_v52 = vsel %vm174_vm4, %v2449_v44, %v171_v50 }
 0x284   :  { %v180_v53 = vsel %vm177_vm5, %v179_v51, %v175_v52  ;;  %v2451_v59 = vpop.eup %2450 }
 0x285   :  { %v181_v54 = vmul.f32 %v2443_v31, %v180_v53  ;;  %v326_v60 = vmul.f32 %v2451_v59, %v321_v57  ;;  %vm331_vm9 = vweird.f32 %v2451_v59 }
 0x286   :  { %vm332_vm12 = vmor %vm330_vm11, %vm331_vm9 }
 0x287   :  { %2323 = vmatmul.msk.f32.vlgmr.msrb.gmra.mxu3 %vm95_vm1, %v181_v54  ;;  %v327_v62 = vsub.f32 1.0, %v326_v60 }
 0x288   :  { %376 = vmatpush.msrb.mxu3 %v356_v55 }
 0x289   :  { %v328_v2 = vmul.f32 %v2451_v59, %v327_v62 }
 0x28b   :  { %v278_v56 = vpop.permute.xlu1 %277  ;;  %v329_v12 = vadd.f32 %v2451_v59, %v328_v2 }
 0x28c   :  { %2328 = vmatmul.msk.f32.vlgmr.msra.gmra.mxu2 %vm95_vm1, %v278_v56 }
 0x28d   :  { %v333_v18 = vsel %vm332_vm12, %v2451_v59, %v329_v12 }
 0x28e   :  { %v338_v21 = vsel %vm335_vm13, %v337_v20, %v333_v18 }
 0x28f   :  { %v339_v22 = vmul.f32 %v2688_v35, %v338_v21 }
 0x2bc   :  { %v166_v58 = vpop.xlane.xlu2 %165 }
 0x2bd   :  { %2452 = vrcp.f32 %v166_v58  ;;  %v193_v1 = vand.u32 2147483648, %v166_v58  ;;  %v191_v7 = vand.u32 2147483647, %v166_v58  ;;  %vm187_vm7 = vweird.f32 %v166_v58 }
 0x2bf   :  { %v194_v10 = vor.u32 1.1754944e-38, %v193_v1  ;;  %vm192_vm10 = vcmp.eq.f32.partialorder %v191_v7, 8.507059e+37 }
 0x2c3   :  { %v2453_v61 = vpop.eup %2452 }
 0x2c4   :  { %v183_v63 = vmul.f32 %v2453_v61, %v166_v58  ;;  %vm188_vm6 = vweird.f32 %v2453_v61  ;;  %v468_v19 = vpop.permute.xlu2 %467 }
 0x2c5   :  { %vm189_vm8 = vmor %vm187_vm7, %vm188_vm6 }
 0x2c6   :  { %v184_v0 = vsub.f32 1.0, %v183_v63 }
 0x2c8   :  { %v185_v3 = vmul.f32 %v2453_v61, %v184_v0 }
 0x2ca   :  { %v186_v8 = vadd.f32 %v2453_v61, %v185_v3 }
 0x2cc   :  { %v190_v13 = vsel %vm189_vm8, %v2453_v61, %v186_v8 }
 0x2cd   :  { %v195_v15 = vsel %vm192_vm10, %v194_v10, %v190_v13 }
 0x2ce   :  { %v196_v17 = vmul.f32 %v2447_v41, %v195_v15 }
 0x2d0   :  { %2324 = vmatmul.msk.f32.vlgmr.msra.gmra.mxu3 %vm95_vm1, %v196_v17 }
 0x2d1   :  { %2335 = vmatpush.xpose.msk.msra.mxu3 %vm95_vm1, %v468_v19 }
 0x2d8   :  { %2329 = vmatmul.msk.f32.vlgmr.msrb.gmra.mxu3 %vm95_vm1, %v339_v22 }
 0x2e0   :  { %2336 = vmatmul.msk.f32.vlgmr.msra.gmra.mxu3 %vm95_vm1, %v466_v23 }
 0x30a   :  { %v220_v25 = vpop.f32.mrf.mxu3 }
 0x30b   :  { %2333 = vmatmul.msk.f32.vlgmr.msrb.gmra.mxu0 %vm95_vm1, %v220_v25 }
 0x30f   :  { %v302_v26 = vpop.f32.mrf.mxu2 }
 0x310   :  { %v306_v27 = vmul.f32 0.35355338, %v302_v26 }
 0x312   :  { %v310_v28 = vsel %vm95_vm1, %v306_v27, -inf }
 0x313   :  { %311 = vmax.xlane.f32.xlu2 %v310_v28 }
 0x32b   :  { %493 = vrot.lane.b32.xlu2 %v2660_v11, %s2568_s22 }
 0x353   :  { %v246_v30 = vpop.f32.mrf.mxu3 }
 0x354   :  { %2334 = vmatmul.msk.f32.gmra.mxu0 %vm95_vm1, %v246_v30 }
 0x35b   :  { %v378_v31 = vpop.f32.mrf.mxu3 }
 0x35c   :  { %2331 = vmatmul.msk.f32.vlgmr.msrb.gmra.mxu2 %vm95_vm1, %v378_v31 }
 0x363   :  { %v490_v32 = vpop.f32.mrf.mxu3 }
 0x364   :  { %v521_v33 = vmul.f32 0.35355338, %v490_v32 }
 0x366   :  { %v523_v34 = vsel %vm95_vm1, %v521_v33, -inf }
 0x367   :  { %524 = vmax.xlane.f32.xlu1 %v523_v34 }
 0x380   :  { %381 = vrot.lane.b32.xlu1 %v2660_v11, %s2569_s23 }
 0x386   :  { %v312_v35 = vpop.xlane.xlu2 %311 }
 0x387   :  { %v314_v36 = vsub.f32 %v306_v27, %v312_v35  ;;  %v38_v27 = vld [vmem:[%s3182_s2 + $0x10] sm:$0xff] }
 0x388   :  { %656 = vrot.lane.b32.xlu1 %v2654_v9, %s2571_s29  ;;  %v2742_v18 = vpop.f32.mrf.mxu0  ;;  %644 = vmatpush.msra.mxu2 %v38_v27  ;;  %v39_v27 = vld [vmem:[%s3182_s2 + $0x18] sm:$0xff] }
 0x389   :  { %v317_v37 = vmul.f32 1.442695, %v314_v36 }
 0x38b   :  { %2454 = vpow2.f32 %v317_v37 }
 0x38e   :  { %v494_v60 = vpop.permute.xlu2 %493 }
 0x390   :  { %682 = vrot.lane.b32.xlu1 %v2660_v11, %s2572_s30 }
 0x391   :  { %v2455_v38 = vpop.eup %2454 }
 0x392   :  { %v322_v39 = vsel %vm95_vm1, %v2455_v38, 0.0 }
 0x393   :  { %323 = vadd.xlane.f32.xlu0 %v322_v39 }
 0x3a7   :  { %495 = vrot.lane.b32.xlu0 %v2660_v11, %s2570_s24 }
 0x3af   :  { %571 = vrot.lane.b32.xlu0 %v2654_v9, %s2573_s9 }
 0x3b7   :  { %654 = vrot.lane.b32.xlu0 %v2654_v9, %s2572_s30 }
 0x3d1   :  { %v2745_v20 = vpop.f32.mrf.mxu0 }
 0x3da   :  { %v525_v40 = vpop.xlane.xlu1 %524 }
 0x3db   :  { %v529_v41 = vsub.f32 %v521_v33, %v525_v40 }
 0x3dd   :  { %v531_v42 = vmul.f32 1.442695, %v529_v41 }
 0x3df   :  { %2456 = vpow2.f32 %v531_v42 }
 0x3e5   :  { %v2457_v43 = vpop.eup %2456 }
 0x3e6   :  { %v535_v44 = vsel %vm95_vm1, %v2457_v43, 0.0 }
 0x3e7   :  { %536 = vadd.xlane.f32.xlu2 %v535_v44 }
 0x3f2   :  { %v382_v45 = vpop.permute.xlu1 %381 }
 0x3f3   :  { %402 = vmatpush.msra.mxu1 %v382_v45 }
 0x3fa   :  { %v657_v46 = vpop.permute.xlu1 %656 }
 0x3fb   :  { %2343 = vmatpush.xpose.msk.msra.mxu0 %vm95_vm1, %v657_v46 }
 0x3ff   :  { %684 = vrot.lane.b32.xlu2 %v2660_v11, %s2571_s29 }
 0x402   :  { %v683_v17 = vpop.permute.xlu1 %682 }
 0x406   :  { %v324_v47 = vpop.xlane.xlu0 %323 }
 0x407   :  { %2458 = vrcp.f32 %v324_v47  ;;  %v351_v51 = vand.u32 2147483648, %v324_v47  ;;  %v349_v53 = vand.u32 2147483647, %v324_v47  ;;  %vm345_vm15 = vweird.f32 %v324_v47 }
 0x409   :  { %v352_v55 = vor.u32 1.1754944e-38, %v351_v51  ;;  %vm350_vm3 = vcmp.eq.f32.partialorder %v349_v53, 8.507059e+37 }
 0x40d   :  { %v2459_v48 = vpop.eup %2458 }
 0x40e   :  { %v341_v49 = vmul.f32 %v2459_v48, %v324_v47  ;;  %vm346_vm14 = vweird.f32 %v2459_v48 }
 0x40f   :  { %vm347_vm2 = vmor %vm345_vm15, %vm346_vm14 }
 0x410   :  { %v342_v50 = vsub.f32 1.0, %v341_v49 }
 0x412   :  { %v343_v52 = vmul.f32 %v2459_v48, %v342_v50 }
 0x414   :  { %v344_v54 = vadd.f32 %v2459_v48, %v343_v52 }
 0x416   :  { %v348_v56 = vsel %vm347_vm2, %v2459_v48, %v344_v54 }
 0x417   :  { %v353_v57 = vsel %vm350_vm3, %v352_v55, %v348_v56 }
 0x418   :  { %v354_v58 = vmul.f32 %v2455_v38, %v353_v57 }
 0x419   :  { %v496_v59 = vpop.permute.xlu0 %495 }
 0x41a   :  { %2330 = vmatmul.msk.f32.vlgmr.msra.gmra.mxu1 %vm95_vm1, %v354_v58 }
 0x41b   :  { %2337 = vmatpush.xpose.msk.msrb.mxu1 %vm95_vm1, %v496_v59 }
 0x421   :  { %v572_v61 = vpop.permute.xlu0 %571 }
 0x422   :  { %2338 = vmatmul.msk.f32.vlgmr.msrb.gmra.mxu1 %vm95_vm1, %v494_v60  ;;  %592 = vmatpush.msrb.mxu3 %v572_v61 }
 0x429   :  { %v655_v62 = vpop.permute.xlu0 %654 }
 0x42a   :  { %2344 = vmatmul.msk.f32.vlgmr.msra.gmra.mxu0 %vm95_vm1, %v655_v62 }
 0x45a   :  { %v537_v63 = vpop.xlane.xlu2 %536 }
 0x45b   :  { %2460 = vrcp.f32 %v537_v63  ;;  %v552_v7 = vand.u32 2147483648, %v537_v63  ;;  %v550_v10 = vand.u32 2147483647, %v537_v63  ;;  %vm546_vm5 = vweird.f32 %v537_v63 }
 0x45d   :  { %v553_v13 = vor.u32 1.1754944e-38, %v552_v7  ;;  %vm551_vm7 = vcmp.eq.f32.partialorder %v550_v10, 8.507059e+37 }
 0x461   :  { %v2461_v0 = vpop.eup %2460 }
 0x462   :  { %v542_v1 = vmul.f32 %v2461_v0, %v537_v63  ;;  %v685_v2 = vpop.permute.xlu2 %684  ;;  %vm547_vm4 = vweird.f32 %v2461_v0 }
 0x463   :  { %2345 = vmatpush.xpose.msk.msra.mxu3 %vm95_vm1, %v685_v2  ;;  %vm548_vm6 = vmor %vm546_vm5, %vm547_vm4 }
 0x464   :  { %v543_v3 = vsub.f32 1.0, %v542_v1 }
 0x466   :  { %v544_v8 = vmul.f32 %v2461_v0, %v543_v3 }
 0x468   :  { %v545_v12 = vadd.f32 %v2461_v0, %v544_v8 }
 0x46a   :  { %v549_v14 = vsel %vm548_vm6, %v2461_v0, %v545_v12 }
 0x46b   :  { %v554_v15 = vsel %vm551_vm7, %v553_v13, %v549_v14 }
 0x46c   :  { %v555_v16 = vmul.f32 %v2457_v43, %v554_v15 }
 0x46e   :  { %2339 = vmatmul.msk.f32.vlgmr.msrb.gmra.mxu3 %vm95_vm1, %v555_v16 }
 0x46f   :  { %833 = vmatpush.msrb.mxu3 %v39_v27 }
 0x476   :  { %2346 = vmatmul.msk.f32.vlgmr.msra.gmra.mxu3 %vm95_vm1, %v683_v17 }
 0x497   :  { %v404_v19 = vpop.f32.mrf.mxu1 }
 0x498   :  { %2332 = vmatmul.msk.f32.gmra.mxu2 %vm95_vm1, %v404_v19 }
 0x49f   :  { %v518_v21 = vpop.f32.mrf.mxu1 }
 0x4a0   :  { %v522_v22 = vmul.f32 0.35355338, %v518_v21 }
 0x4a2   :  { %v526_v23 = vsel %vm95_vm1, %v522_v22, -inf }
 0x4a3   :  { %527 = vmax.xlane.f32.xlu2 %v526_v23 }
 0x4a7   :  { %v679_v24 = vpop.f32.mrf.mxu0 }
 0x4a8   :  { %v710_v25 = vmul.f32 0.35355338, %v679_v24 }
 0x4aa   :  { %v712_v26 = vsel %vm95_vm1, %v710_v25, -inf }
 0x4ab   :  { %713 = vmax.xlane.f32.xlu0 %v712_v26 }
 0x4f1   :  { %v594_v28 = vpop.f32.mrf.mxu3 }
 0x4f2   :  { %2341 = vmatmul.msk.f32.vlgmr.msra.gmra.mxu2 %vm95_vm1, %v594_v28 }
 0x4f9   :  { %v707_v29 = vpop.f32.mrf.mxu3 }
 0x4fa   :  { %v711_v30 = vmul.f32 0.35355338, %v707_v29 }
 0x4fc   :  { %v715_v31 = vsel %vm95_vm1, %v711_v30, -inf }
 0x4fd   :  { %716 = vmax.xlane.f32.xlu1 %v715_v31  ;;  %v430_v31 = vpop.f32.mrf.mxu2 }
 0x516   :  { %v528_v32 = vpop.xlane.xlu2 %527 }
 0x517   :  { %v530_v33 = vsub.f32 %v522_v22, %v528_v32 }
 0x519   :  { %v533_v34 = vmul.f32 1.442695, %v530_v33 }
 0x51b   :  { %2462 = vpow2.f32 %v533_v34  ;;  %v433_v32 = vpop.f32.mrf.mxu2  ;;  %v460_v34 = vadd.f32 %v2742_v18, %v430_v31 }
 0x51e   :  { %v714_v35 = vpop.xlane.xlu0 %713 }
 0x51f   :  { %v718_v36 = vsub.f32 %v710_v25, %v714_v35 }
 0x521   :  { %v2463_v37 = vpop.eup %2462  ;;  %v720_v38 = vmul.f32 1.442695, %v718_v36  ;;  %v843_v36 = vperm.slane %v2651_v6, 1 }
 0x522   :  { %v538_v39 = vsel %vm95_vm1, %v2463_v37, 0.0 }
 0x523   :  { %2464 = vpow2.f32 %v720_v38  ;;  %539 = vadd.xlane.f32.xlu2 %v538_v39 }
 0x529   :  { %v2465_v40 = vpop.eup %2464 }
 0x52a   :  { %v724_v41 = vsel %vm95_vm1, %v2465_v40, 0.0 }
 0x52b   :  { %725 = vadd.xlane.f32.xlu0 %v724_v41 }
 0x53b   :  { %597 = vrot.lane.b32.xlu2 %v2660_v11, %s2573_s9 }
 0x53f   :  { %760 = vrot.lane.b32.xlu0 %v2654_v9, %s2574_s12 }
 0x570   :  { %v717_v42 = vpop.xlane.xlu1 %716 }
 0x571   :  { %v719_v43 = vsub.f32 %v711_v30, %v717_v42 }
 0x573   :  { %v722_v44 = vmul.f32 1.442695, %v719_v43  ;;  %v463_v43 = vadd.f32 %v2745_v20, %v433_v32 }
 0x575   :  { %2466 = vpow2.f32 %v722_v44  ;;  %v646_v33 = vpop.f32.mrf.mxu2 }
 0x576   :  { %v652_v35 = vadd.f32 %v646_v33, %v460_v34 }
 0x57b   :  { %v2467_v45 = vpop.eup %2466 }
 0x57c   :  { %v727_v46 = vsel %vm95_vm1, %v2467_v45, 0.0 }
 0x57d   :  { %728 = vadd.xlane.f32.xlu1 %v727_v46 }
 0x596   :  { %v540_v47 = vpop.xlane.xlu2 %539  ;;  %786 = vrot.lane.b32.xlu1 %v2660_v11, %s2574_s12 }
 0x597   :  { %2468 = vrcp.f32 %v540_v47  ;;  %v567_v52 = vand.u32 2147483648, %v540_v47  ;;  %v565_v54 = vand.u32 2147483647, %v540_v47  ;;  %vm561_vm9 = vweird.f32 %v540_v47 }
 0x599   :  { %v568_v57 = vor.u32 1.1754944e-38, %v567_v52  ;;  %vm566_vm11 = vcmp.eq.f32.partialorder %v565_v54, 8.507059e+37 }
 0x59d   :  { %v2469_v48 = vpop.eup %2468 }
 0x59e   :  { %v557_v49 = vmul.f32 %v2469_v48, %v540_v47  ;;  %v598_v50 = vpop.permute.xlu2 %597  ;;  %v726_v51 = vpop.xlane.xlu0 %725  ;;  %vm562_vm8 = vweird.f32 %v2469_v48 }
 0x59f   :  { %2470 = vrcp.f32 %v726_v51  ;;  %618 = vmatpush.msra.mxu1 %v598_v50  ;;  %vm563_vm10 = vmor %vm561_vm9, %vm562_vm8  ;;  %v741_v62 = vand.u32 2147483648, %v726_v51  ;;  %v739_v0 = vand.u32 2147483647, %v726_v51  ;;  %vm735_vm13 = vweird.f32 %v726_v51 }
 0x5a0   :  { %v558_v9 = vsub.f32 1.0, %v557_v49  ;;  %v2575_v49 = vmov 32.0  }
 0x5a1   :  { %v742_v2 = vor.u32 1.1754944e-38, %v741_v62  ;;  %vm740_vm15 = vcmp.eq.f32.partialorder %v739_v0, 8.507059e+37  ;;  %v42_v62 = vld [vmem:[%s3183_s3 + $0x10] sm:$0xff]  ;;  %v40_v0 = vld [vmem:[%s3183_s3] sm:$0xff] }
 0x5a2   :  { %v559_v53 = vmul.f32 %v2469_v48, %v558_v9 }
 0x5a4   :  { %v560_v55 = vadd.f32 %v2469_v48, %v559_v53 }
 0x5a5   :  { %v2471_v56 = vpop.eup %2470 }
 0x5a6   :  { %v564_v58 = vsel %vm563_vm10, %v2469_v48, %v560_v55  ;;  %v731_v11 = vmul.f32 %v2471_v56, %v726_v51  ;;  %vm736_vm12 = vweird.f32 %v2471_v56 }
 0x5a7   :  { %v569_v59 = vsel %vm566_vm11, %v568_v57, %v564_v58  ;;  %vm737_vm14 = vmor %vm735_vm13, %vm736_vm12 }
 0x5a8   :  { %v732_v60 = vsub.f32 1.0, %v731_v11  ;;  %v570_v61 = vmul.f32 %v2463_v37, %v569_v59 }
 0x5aa   :  { %v733_v63 = vmul.f32 %v2471_v56, %v732_v60  ;;  %2340 = vmatmul.msk.f32.vlgmr.msra.gmra.mxu1 %vm95_vm1, %v570_v61  ;;  %v43_v61 = vld [vmem:[%s3183_s3 + $0x18] sm:$0xff] }
 0x5ac   :  { %v734_v1 = vadd.f32 %v2471_v56, %v733_v63  ;;  %v41_v63 = vld [vmem:[%s3183_s3 + $0x8] sm:$0xff] }
 0x5ae   :  { %v738_v3 = vsel %vm737_vm14, %v2471_v56, %v734_v1 }
 0x5af   :  { %v743_v7 = vsel %vm740_vm15, %v742_v2, %v738_v3 }
 0x5b0   :  { %v744_v8 = vmul.f32 %v2465_v40, %v743_v7 }
 0x5b1   :  { %v761_v10 = vpop.permute.xlu0 %760 }
 0x5b2   :  { %781 = vmatpush.msrb.mxu1 %v761_v10 }
 0x5b3   :  { %2347 = vmatmul.msk.f32.vlgmr.msrb.gmra.mxu1 %vm95_vm1, %v744_v8 }
 0x5b4   :  { %924 = vmatpush.msra.mxu1 %v43_v61  ;;  %v45_v61 = vld [vmem:[%s3184_s4 + $0x8] sm:$0xff] }
 0x5b6   :  { %925 = vmatpush.msra.mxu1 %v42_v62 }
 0x5b8   :  { %926 = vmatpush.msra.mxu1 %v41_v63  ;;  %v44_v63 = vld [vmem:[%s3184_s4] sm:$0xff] }
 0x5ba   :  { %927 = vmatpush.msra.mxu1 %v40_v0 }
 0x5f0   :  { %v729_v12 = vpop.xlane.xlu1 %728 }
 0x5f1   :  { %2472 = vrcp.f32 %v729_v12  ;;  %v756_v19 = vand.u32 2147483648, %v729_v12  ;;  %vm750_vm3 = vweird.f32 %v729_v12  ;;  %v754_v21 = vand.u32 2147483647, %v729_v12 }
 0x5f2   :  { %2474 = vrcp.f32 %v2575_v49  ;;  %v51_v49 = vld [vmem:[%s3184_s4 + $0x38] sm:$0xff] }
 0x5f3   :  { %v757_v23 = vor.u32 1.1754944e-38, %v756_v19  ;;  %vm755_vm5 = vcmp.eq.f32.partialorder %v754_v21, 8.507059e+37  ;;  %v902_v19 = vperm.slane %v2651_v6, 5 }
 0x5f7   :  { %v2473_v13 = vpop.eup %2472 }
 0x5f8   :  { %v746_v14 = vmul.f32 %v2473_v13, %v729_v12  ;;  %vm751_vm2 = vweird.f32 %v2473_v13  ;;  %v2475_v50 = vpop.eup %2474 }
 0x5f9   :  { %vm752_vm4 = vmor %vm750_vm3, %vm751_vm2  ;;  %v855_v51 = vmul.f32 32.0, %v2475_v50  ;;  %vm859_vm6 = vweird.f32 %v2475_v50 }
 0x5fa   :  { %v747_v15 = vsub.f32 1.0, %v746_v14 }
 0x5fc   :  { %v748_v16 = vmul.f32 %v2473_v13, %v747_v15  ;;  %v899_v15 = vperm.slane %v2651_v6, 4 }
 0x5fe   :  { %v749_v17 = vadd.f32 %v2473_v13, %v748_v16 }
 0x600   :  { %v753_v22 = vsel %vm752_vm4, %v2473_v13, %v749_v17 }
 0x601   :  { %v758_v24 = vsel %vm755_vm5, %v757_v23, %v753_v22 }
 0x602   :  { %v759_v26 = vmul.f32 %v2467_v45, %v758_v24 }
 0x608   :  { %v787_v25 = vpop.permute.xlu1 %786 }
 0x609   :  { %807 = vmatpush.msrb.mxu0 %v787_v25 }
 0x60a   :  { %2348 = vmatmul.msk.f32.vlgmr.msrb.gmra.mxu0 %vm95_vm1, %v759_v26 }
 0x627   :  { %v620_v28 = vpop.f32.mrf.mxu1 }
 0x628   :  { %2342 = vmatmul.msk.f32.gmra.mxu2 %vm95_vm1, %v620_v28 }
 0x630   :  { %v783_v29 = vpop.f32.mrf.mxu1 }
 0x631   :  { %2349 = vmatmul.msk.f32.vlgmr.msrb.gmra.mxu3 %vm95_vm1, %v783_v29 }
 0x687   :  { %v809_v30 = vpop.f32.mrf.mxu0 }
 0x688   :  { %2350 = vmatmul.msk.f32.gmra.mxu3 %vm95_vm1, %v809_v30 }
 0x6ab   :  { %v649_v42 = vpop.f32.mrf.mxu2 }
 0x6ac   :  { %v653_v44 = vadd.f32 %v649_v42, %v463_v43 }
 0x6b4   :  { %v835_v37 = vpop.f32.mrf.mxu3 }
 0x6b5   :  { %v841_v38 = vadd.f32 %v835_v37, %v652_v35  ;;  %v58_v37 = vld [vmem:[%s3184_s4 + $0x70] sm:$0xff] }
 0x6b7   :  { %v844_v39 = vadd.f32 %v843_v36, %v841_v38  ;;  %v57_v38 = vld [vmem:[%s3184_s4 + $0x68] sm:$0xff] }
 0x6b9   :  { %v846_v40 = vadd.f32 %v844_v39, %v2637_v4  ;;  %v856_v4 = vsub.f32 1.0, %v855_v51  ;;  %v905_v39 = vperm.slane %v2651_v6, 2 }
 0x6bb   :  { %v848_v41 = vsel %vm62_vm0, %v846_v40, 0.0  ;;  %v857_v9 = vmul.f32 %v2475_v50, %v856_v4  ;;  %v50_v4 = vld [vmem:[%s3184_s4 + $0x30] sm:$0xff] }
 0x6bc   :  { %849 = vadd.xlane.f32.xlu0 %v848_v41  ;;  %v55_v41 = vld [vmem:[%s3184_s4 + $0x58] sm:$0xff] }
 0x6bd   :  { %v858_v52 = vadd.f32 %v2475_v50, %v857_v9 }
 0x6bf   :  { %v2779_v53 = vsel %vm859_vm6, %v2475_v50, %v858_v52 }
 0x70b   :  { %v838_v45 = vpop.f32.mrf.mxu3 }
 0x70c   :  { %v842_v46 = vadd.f32 %v838_v45, %v653_v44  ;;  %v54_v44 = vld [vmem:[%s3184_s4 + $0x50] sm:$0xff] }
 0x70e   :  { %v845_v47 = vadd.f32 %v843_v36, %v842_v46  ;;  %v59_v36 = vld [vmem:[%s3184_s4 + $0x78] sm:$0xff]  ;;  %v53_v46 = vld [vmem:[%s3184_s4 + $0x48] sm:$0xff] }
 0x70f   :  { %1024 = vmatpush.msrb.mxu2 %v59_v36 }
 0x710   :  { %v847_v18 = vadd.f32 %v845_v47, %v2644_v5 }
 0x711   :  { %1025 = vmatpush.msrb.mxu2 %v58_v37 }
 0x712   :  { %v851_v48 = vsel %vm62_vm0, %v847_v18, 0.0 }
 0x713   :  { %852 = vadd.xlane.f32.xlu2 %v851_v48  ;;  %1026 = vmatpush.msrb.mxu2 %v57_v38 }
 0x72f   :  { %v850_v20 = vpop.xlane.xlu0 %849 }
 0x730   :  { %v861_v54 = vmul.f32 %v2779_v53, %v850_v20  ;;  %v49_v20 = vld [vmem:[%s3184_s4 + $0x28] sm:$0xff] }
 0x732   :  { %v863_v55 = vsub.f32 %v846_v40, %v861_v54  ;;  %v56_v40 = vld [vmem:[%s3184_s4 + $0x60] sm:$0xff] }
 0x733   :  { %1027 = vmatpush.msrb.mxu2 %v56_v40 }
 0x734   :  { %v865_v56 = vmul.f32 %v863_v55, %v863_v55 }
 0x735   :  { %1028 = vmatpush.msrb.mxu2 %v55_v41 }
 0x736   :  { %v867_v5 = vsel %vm62_vm0, %v865_v56, 0.0  ;;  %v48_v56 = vld [vmem:[%s3184_s4 + $0x20] sm:$0xff] }
 0x737   :  { %868 = vadd.xlane.f32.xlu1 %v867_v5  ;;  %1029 = vmatpush.msrb.mxu2 %v54_v44 }
 0x739   :  { %1030 = vmatpush.msrb.mxu2 %v53_v46 }
 0x786   :  { %v853_v57 = vpop.xlane.xlu2 %852 }
 0x787   :  { %v862_v58 = vmul.f32 %v2779_v53, %v853_v57  ;;  %v47_v57 = vld [vmem:[%s3184_s4 + $0x18] sm:$0xff] }
 0x789   :  { %v864_v11 = vsub.f32 %v847_v18, %v862_v58  ;;  %v52_v18 = vld [vmem:[%s3184_s4 + $0x40] sm:$0xff] }
 0x78a   :  { %1031 = vmatpush.msrb.mxu2 %v52_v18 }
 0x78b   :  { %v866_v59 = vmul.f32 %v864_v11, %v864_v11 }
 0x78c   :  { %1032 = vmatpush.msrb.mxu2 %v51_v49 }
 0x78d   :  { %v870_v60 = vsel %vm62_vm0, %v866_v59, 0.0  ;;  %v46_v59 = vld [vmem:[%s3184_s4 + $0x10] sm:$0xff] }
 0x78e   :  { %871 = vadd.xlane.f32.xlu2 %v870_v60  ;;  %1033 = vmatpush.msrb.mxu2 %v50_v4 }
 0x790   :  { %1034 = vmatpush.msrb.mxu2 %v49_v20 }
 0x792   :  { %1035 = vmatpush.msrb.mxu2 %v48_v56 }
 0x794   :  { %1036 = vmatpush.msrb.mxu2 %v47_v57 }
 0x796   :  { %1037 = vmatpush.msrb.mxu2 %v46_v59 }
 0x798   :  { %1038 = vmatpush.msrb.mxu2 %v45_v61 }
 0x79a   :  { %1039 = vmatpush.msrb.mxu2 %v44_v63 }
 0x7aa   :  { %v869_v1 = vpop.xlane.xlu1 %868 }
 0x7ab   :  { %v873_v2 = vmul.f32 %v869_v1, %v2779_v53 }
 0x7ad   :  { %v875_v3 = vadd.f32 1e-05, %v873_v2 }
 0x7af   :  { %2476 = vrsqrt.f32 %v875_v3  ;;  %vm883_vm8 = vweird.f32 %v875_v3 }
 0x7b5   :  { %v2477_v7 = vpop.eup %2476 }
 0x7b6   :  { %v878_v8 = vmul.f32 %v2477_v7, %v875_v3  ;;  %vm884_vm7 = vweird.f32 %v2477_v7 }
 0x7b7   :  { %vm885_vm9 = vmor %vm883_vm8, %vm884_vm7 }
 0x7b8   :  { %v879_v10 = vmul.f32 %v2477_v7, %v878_v8 }
 0x7ba   :  { %v880_v12 = vmul.f32 0.5, %v879_v10 }
 0x7bc   :  { %v881_v13 = vsub.f32 1.5, %v880_v12 }
 0x7be   :  { %v882_v14 = vmul.f32 %v2477_v7, %v881_v13 }
 0x7c0   :  { %v886_v16 = vsel %vm885_vm9, %v2477_v7, %v882_v14 }
 0x7c1   :  { %v897_v17 = vmul.f32 %v886_v16, %v863_v55 }
 0x7c3   :  { %v900_v21 = vmul.f32 %v899_v15, %v897_v17 }
 0x7c5   :  { %v2800_v22 = vadd.f32 %v902_v19, %v900_v21 }
 0x7c7   :  { %2351 = vmatmul.msk.f32.vlgmr.msra.gmra.mxu1 %vm62_vm0, %v2800_v22 }
 0x801   :  { %v872_v23 = vpop.xlane.xlu2 %871 }
 0x802   :  { %v874_v24 = vmul.f32 %v872_v23, %v2779_v53 }
 0x804   :  { %v876_v25 = vadd.f32 1e-05, %v874_v24 }
 0x806   :  { %2478 = vrsqrt.f32 %v876_v25  ;;  %vm893_vm11 = vweird.f32 %v876_v25 }
 0x80c   :  { %v2479_v26 = vpop.eup %2478 }
 0x80d   :  { %v888_v27 = vmul.f32 %v2479_v26, %v876_v25  ;;  %vm894_vm10 = vweird.f32 %v2479_v26 }
 0x80e   :  { %vm895_vm12 = vmor %vm893_vm11, %vm894_vm10 }
 0x80f   :  { %v889_v28 = vmul.f32 %v2479_v26, %v888_v27 }
 0x811   :  { %v890_v29 = vmul.f32 0.5, %v889_v28 }
 0x813   :  { %v891_v30 = vsub.f32 1.5, %v890_v29 }
 0x815   :  { %v892_v31 = vmul.f32 %v2479_v26, %v891_v30 }
 0x817   :  { %v896_v32 = vsel %vm895_vm12, %v2479_v26, %v892_v31 }
 0x818   :  { %v898_v33 = vmul.f32 %v896_v32, %v864_v11 }
 0x81a   :  { %v901_v34 = vmul.f32 %v899_v15, %v898_v33 }
 0x81c   :  { %v2805_v35 = vadd.f32 %v902_v19, %v901_v34 }
 0x81e   :  { %2352 = vmatmul.msk.f32.gmra.mxu1 %vm62_vm0, %v2805_v35 }
 0x844   :  { %v929_v42 = vpop.f32.mrf.mxu1 }
 0x845   :  { %v2827_v43 = vadd.f32 %v929_v42, %v905_v39 }
 0x847   :  { %v937_v45 = vmul.f32 0.70710677, %v2827_v43  ;;  %v935_v30 = vmul.f32 0.5, %v2827_v43 }
 0x849   :  { %v939_v47 = vmul.f32 %v937_v45, %v937_v45 }
 0x84b   :  { %v940_v48 = vmin.f32 %v939_v47, 16.0 }
 0x84d   :  { %v941_v50 = vmul.f32 2.1237322e-06, %v940_v48  ;;  %v952_v51 = vmul.f32 3.8918573e-05, %v940_v48 }
 0x84f   :  { %v942_v9 = vadd.f32 0.00028619796, %v941_v50  ;;  %v953_v52 = vadd.f32 0.001143296, %v952_v51 }
 0x851   :  { %v943_v54 = vmul.f32 %v942_v9, %v940_v48  ;;  %v954_v55 = vmul.f32 %v953_v52, %v940_v48 }
 0x853   :  { %v955_v5 = vadd.f32 0.014752088, %v954_v55  ;;  %v944_v58 = vadd.f32 0.0036580483, %v943_v54 }
 0x855   :  { %v956_v11 = vmul.f32 %v955_v5, %v940_v48  ;;  %v945_v62 = vmul.f32 %v944_v58, %v940_v48 }
 0x857   :  { %v957_v60 = vadd.f32 0.112945676, %v956_v11  ;;  %v946_v2 = vadd.f32 0.05243302, %v945_v62 }
 0x859   :  { %v958_v0 = vmul.f32 %v957_v60, %v940_v48  ;;  %v947_v8 = vmul.f32 %v946_v2, %v940_v48 }
 0x85b   :  { %v959_v1 = vadd.f32 0.4994258, %v958_v0  ;;  %v948_v10 = vadd.f32 0.18741608, %v947_v8  ;;  %v2869_v8 = vld [vmem:[%s3185_s5] sm:$0xff] }
 0x85d   :  { %v960_v3 = vmul.f32 %v959_v1, %v940_v48  ;;  %v949_v13 = vmul.f32 %v948_v10, %v940_v48  ;;  %v1023_v10 = vperm.slane %v2869_v8, 3 }
 0x85f   :  { %v961_v7 = vadd.f32 1.0, %v960_v3  ;;  %v950_v17 = vadd.f32 1.1283791, %v949_v13 }
 0x861   :  { %2480 = vrcp.f32 %v961_v7  ;;  %v973_v16 = vand.u32 2147483648, %v961_v7  ;;  %v971_v21 = vand.u32 2147483647, %v961_v7  ;;  %vm967_vm14 = vweird.f32 %v961_v7 }
 0x862   :  { %v951_v25 = vmul.f32 %v950_v17, %v937_v45 }
 0x863   :  { %v974_v24 = vor.u32 1.1754944e-38, %v973_v16  ;;  %vm972_vm2 = vcmp.eq.f32.partialorder %v971_v21, 8.507059e+37 }
 0x867   :  { %v2481_v12 = vpop.eup %2480 }
 0x868   :  { %v963_v14 = vmul.f32 %v2481_v12, %v961_v7  ;;  %vm968_vm13 = vweird.f32 %v2481_v12 }
 0x869   :  { %vm969_vm15 = vmor %vm967_vm14, %vm968_vm13 }
 0x86a   :  { %v964_v15 = vsub.f32 1.0, %v963_v14 }
 0x86c   :  { %v965_v19 = vmul.f32 %v2481_v12, %v964_v15 }
 0x86e   :  { %v966_v23 = vadd.f32 %v2481_v12, %v965_v19 }
 0x870   :  { %v970_v26 = vsel %vm969_vm15, %v2481_v12, %v966_v23 }
 0x871   :  { %v975_v27 = vsel %vm972_vm2, %v974_v24, %v970_v26 }
 0x872   :  { %v976_v28 = vmul.f32 %v975_v27, %v951_v25 }
 0x874   :  { %v2353_v29 = vclamps-f32 %v976_v28, 1.0 }
 0x876   :  { %v1019_v31 = vadd.f32 1.0, %v2353_v29 }
 0x878   :  { %v1021_v32 = vmul.f32 %v1019_v31, %v935_v30 }
 0x87a   :  { %1040 = vmatmul.f32.vlgmr.msrb.gmra.mxu2 %v1021_v32  ;;  %v2357_v32 = vld [vmem:[%s3181_s1 + $0x30] sm:$0xff] }
 0x89b   :  { %v932_v33 = vpop.f32.mrf.mxu1 }
 0x89c   :  { %v933_v34 = vadd.f32 %v932_v33, %v905_v39  ;;  %v2356_v33 = vld [vmem:[%s3181_s1 + $0x28] sm:$0xff] }
 0x89e   :  { %v938_v36 = vmul.f32 0.70710677, %v933_v34  ;;  %v936_v2 = vmul.f32 0.5, %v933_v34  ;;  %v2355_v34 = vld [vmem:[%s3181_s1 + $0x20] sm:$0xff] }
 0x8a0   :  { %v979_v37 = vmul.f32 %v938_v36, %v938_v36 }
 0x8a2   :  { %v980_v38 = vmin.f32 %v979_v37, 16.0 }
 0x8a4   :  { %v981_v40 = vmul.f32 2.1237322e-06, %v980_v38  ;;  %v992_v41 = vmul.f32 3.8918573e-05, %v980_v38 }
 0x8a6   :  { %v982_v42 = vadd.f32 0.00028619796, %v981_v40  ;;  %v993_v44 = vadd.f32 0.001143296, %v992_v41 }
 0x8a8   :  { %v983_v45 = vmul.f32 %v982_v42, %v980_v38  ;;  %v994_v46 = vmul.f32 %v993_v44, %v980_v38 }
 0x8aa   :  { %v995_v47 = vadd.f32 0.014752088, %v994_v46  ;;  %v984_v18 = vadd.f32 0.0036580483, %v983_v45 }
 0x8ac   :  { %v996_v48 = vmul.f32 %v995_v47, %v980_v38  ;;  %v985_v49 = vmul.f32 %v984_v18, %v980_v38  ;;  %v1093_v47 = vperm.slane %v2869_v8, 6 }
 0x8ae   :  { %v997_v43 = vadd.f32 0.112945676, %v996_v48  ;;  %v986_v4 = vadd.f32 0.05243302, %v985_v49 }
 0x8b0   :  { %v998_v50 = vmul.f32 %v997_v43, %v980_v38  ;;  %v987_v39 = vmul.f32 %v986_v4, %v980_v38  ;;  %v1096_v43 = vperm.slane %v2869_v8, 7 }
 0x8b2   :  { %v999_v51 = vadd.f32 0.4994258, %v998_v50  ;;  %v988_v52 = vadd.f32 0.18741608, %v987_v39 }
 0x8b4   :  { %v1000_v9 = vmul.f32 %v999_v51, %v980_v38  ;;  %v989_v54 = vmul.f32 %v988_v52, %v980_v38 }
 0x8b6   :  { %v1001_v6 = vadd.f32 1.0, %v1000_v9  ;;  %v990_v57 = vadd.f32 1.1283791, %v989_v54 }
 0x8b8   :  { %2482 = vrcp.f32 %v1001_v6  ;;  %v1013_v5 = vand.u32 2147483648, %v1001_v6  ;;  %v1011_v11 = vand.u32 2147483647, %v1001_v6  ;;  %vm1007_vm4 = vweird.f32 %v1001_v6 }
 0x8b9   :  { %v991_v61 = vmul.f32 %v990_v57, %v938_v36 }
 0x8ba   :  { %v1014_v60 = vor.u32 1.1754944e-38, %v1013_v5  ;;  %vm1012_vm6 = vcmp.eq.f32.partialorder %v1011_v11, 8.507059e+37  ;;  %v2907_v11 = vld [vmem:[%s3185_s5 + $0x8] sm:$0xff] }
 0x8be   :  { %v2483_v20 = vpop.eup %2482 }
 0x8bf   :  { %v1003_v55 = vmul.f32 %v2483_v20, %v1001_v6  ;;  %vm1008_vm3 = vweird.f32 %v2483_v20 }
 0x8c0   :  { %vm1009_vm5 = vmor %vm1007_vm4, %vm1008_vm3 }
 0x8c1   :  { %v1004_v56 = vsub.f32 1.0, %v1003_v55 }
 0x8c3   :  { %v1005_v58 = vmul.f32 %v2483_v20, %v1004_v56 }
 0x8c5   :  { %v1006_v59 = vadd.f32 %v2483_v20, %v1005_v58 }
 0x8c7   :  { %v1010_v62 = vsel %vm1009_vm5, %v2483_v20, %v1006_v59  ;;  %v1133_v59 = vperm.slane %v2907_v11, 0 }
 0x8c8   :  { %v1015_v63 = vsel %vm1012_vm6, %v1014_v60, %v1010_v62 }
 0x8c9   :  { %v1016_v0 = vmul.f32 %v1015_v63, %v991_v61 }
 0x8cb   :  { %v2354_v1 = vclamps-f32 %v1016_v0, 1.0 }
 0x8cd   :  { %v1020_v3 = vadd.f32 1.0, %v2354_v1 }
 0x8cf   :  { %v1022_v7 = vmul.f32 %v1020_v3, %v936_v2 }
 0x8d1   :  { %1043 = vmatmul.f32.gmra.mxu2 %v1022_v7 }
 0x8fd   :  { %v1041_v12 = vpop.f32.mrf.mxu2 }
 0x8fe   :  { %v1042_v13 = vadd.f32 %v1041_v12, %v1023_v10 }
 0x900   :  { %v1047_v14 = vadd.f32 %v1042_v13, %v2800_v22 }
 0x902   :  { %v1049_v15 = vsel %vm62_vm0, %v1047_v14, 0.0 }
 0x903   :  { %1050 = vadd.xlane.f32.xlu0 %v1049_v15 }
 0x954   :  { %v1044_v16 = vpop.f32.mrf.mxu2 }
 0x955   :  { %v1045_v17 = vadd.f32 %v1044_v16, %v1023_v10 }
 0x957   :  { %v1048_v19 = vadd.f32 %v1045_v17, %v2805_v35  ;;  %v2358_v35 = vld [vmem:[%s3181_s1 + $0x38] sm:$0xff] }
 0x958   :  { %1152 = vmatpush.msra.mxu0 %v2358_v35 }
 0x959   :  { %v1052_v21 = vsel %vm62_vm0, %v1048_v19, 0.0 }
 0x95a   :  { %1053 = vadd.xlane.f32.xlu1 %v1052_v21  ;;  %1153 = vmatpush.msra.mxu0 %v2357_v32 }
 0x95c   :  { %1154 = vmatpush.msra.mxu0 %v2356_v33 }
 0x95e   :  { %1155 = vmatpush.msra.mxu0 %v2355_v34 }
 0x976   :  { %v1051_v23 = vpop.xlane.xlu0 %1050 }
 0x977   :  { %v1055_v24 = vmul.f32 %v1051_v23, %v2779_v53 }
 0x979   :  { %v1057_v25 = vsub.f32 %v1047_v14, %v1055_v24 }
 0x97b   :  { %v1059_v26 = vmul.f32 %v1057_v25, %v1057_v25 }
 0x97d   :  { %v1061_v27 = vsel %vm62_vm0, %v1059_v26, 0.0 }
 0x97e   :  { %1062 = vadd.xlane.f32.xlu2 %v1061_v27 }
 0x9cd   :  { %v1054_v28 = vpop.xlane.xlu1 %1053 }
 0x9ce   :  { %v1056_v22 = vmul.f32 %v1054_v28, %v2779_v53 }
 0x9d0   :  { %v1058_v29 = vsub.f32 %v1048_v19, %v1056_v22 }
 0x9d2   :  { %v1060_v30 = vmul.f32 %v1058_v29, %v1058_v29 }
 0x9d4   :  { %v1064_v31 = vsel %vm62_vm0, %v1060_v30, 0.0 }
 0x9d5   :  { %1065 = vadd.xlane.f32.xlu0 %v1064_v31 }
 0x9f1   :  { %v1063_v36 = vpop.xlane.xlu2 %1062 }
 0x9f2   :  { %v1067_v37 = vmul.f32 %v1063_v36, %v2779_v53 }
 0x9f4   :  { %v1069_v38 = vadd.f32 1e-05, %v1067_v37 }
 0x9f6   :  { %2484 = vrsqrt.f32 %v1069_v38  ;;  %vm1077_vm8 = vweird.f32 %v1069_v38 }
 0x9fc   :  { %v2485_v40 = vpop.eup %2484 }
 0x9fd   :  { %v1072_v41 = vmul.f32 %v2485_v40, %v1069_v38  ;;  %vm1078_vm7 = vweird.f32 %v2485_v40 }
 0x9fe   :  { %vm1079_vm9 = vmor %vm1077_vm8, %vm1078_vm7 }
 0x9ff   :  { %v1073_v42 = vmul.f32 %v2485_v40, %v1072_v41 }
 0xa01   :  { %v1074_v44 = vmul.f32 0.5, %v1073_v42 }
 0xa03   :  { %v1075_v45 = vsub.f32 1.5, %v1074_v44 }
 0xa05   :  { %v1076_v46 = vmul.f32 %v2485_v40, %v1075_v45 }
 0xa07   :  { %v1080_v18 = vsel %vm1079_vm9, %v2485_v40, %v1076_v46 }
 0xa08   :  { %v1091_v48 = vmul.f32 %v1080_v18, %v1057_v25 }
 0xa0a   :  { %v1094_v49 = vmul.f32 %v1093_v47, %v1091_v48 }
 0xa0c   :  { %v2895_v50 = vadd.f32 %v1096_v43, %v1094_v49 }
 0xa0e   :  { %2384 = vmatmul.msk.f32.vlgmr.msra.gmra.mxu0 %vm62_vm0, %v2895_v50 }
 0xa48   :  { %v1066_v51 = vpop.xlane.xlu0 %1065 }
 0xa49   :  { %v1068_v4 = vmul.f32 %v1066_v51, %v2779_v53 }
 0xa4b   :  { %v1070_v9 = vadd.f32 1e-05, %v1068_v4 }
 0xa4d   :  { %2486 = vrsqrt.f32 %v1070_v9  ;;  %vm1087_vm11 = vweird.f32 %v1070_v9 }
 0xa53   :  { %v2487_v6 = vpop.eup %2486 }
 0xa54   :  { %v1082_v39 = vmul.f32 %v2487_v6, %v1070_v9  ;;  %vm1088_vm10 = vweird.f32 %v2487_v6 }
 0xa55   :  { %vm1089_vm12 = vmor %vm1087_vm11, %vm1088_vm10 }
 0xa56   :  { %v1083_v52 = vmul.f32 %v2487_v6, %v1082_v39 }
 0xa58   :  { %v1084_v20 = vmul.f32 0.5, %v1083_v52 }
 0xa5a   :  { %v1085_v54 = vsub.f32 1.5, %v1084_v20 }
 0xa5c   :  { %v1086_v55 = vmul.f32 %v2487_v6, %v1085_v54 }
 0xa5e   :  { %v1090_v56 = vsel %vm1089_vm12, %v2487_v6, %v1086_v55 }
 0xa5f   :  { %v1092_v5 = vmul.f32 %v1090_v56, %v1058_v29 }
 0xa61   :  { %v1095_v57 = vmul.f32 %v1093_v47, %v1092_v5 }
 0xa63   :  { %v2900_v58 = vadd.f32 %v1096_v43, %v1095_v57 }
 0xa65   :  { %2385 = vmatmul.msk.f32.gmra.mxu0 %vm62_vm0, %v2900_v58 }
 0xa8b   :  { %v1157_v60 = vpop.f32.mrf.mxu0 }
 0xa8c   :  { %v2910_v61 = vadd.f32 %v1157_v60, %v1133_v59 }
 0xa8e   :  { %1321 = vrot.lane.b32.xlu0 %v2910_v61, %s2564_s19  ;;  %1164 = vrot.lane.b32.xlu1 %v2910_v61, %s2565_s20 }
 0xa96   :  { %1319 = vrot.lane.b32.xlu0 %v2910_v61, %s2566_s0 }
 0xae2   :  { %v1160_v62 = vpop.f32.mrf.mxu0 }
 0xae3   :  { %v2918_v63 = vadd.f32 %v1160_v62, %v1133_v59 }
 0xae5   :  { %1191 = vrot.lane.b32.xlu2 %v2918_v63, %s2565_s20  ;;  %v2437_v19 = vpack.i.bf16 %v2910_v61, %v2918_v63 }
 0xb00   :  { %v1165_v0 = vpop.permute.xlu1 %1164  ;;  %v1322_v2 = vpop.permute.xlu0 %1321 }
 0xb01   :  { %2386 = vmatpush.xpose.msk.msra.mxu3 %vm95_vm1, %v1165_v0 }
 0xb04   :  { %2387 = vmatmul.msk.f32.vlgmr.msra.gmra.mxu3 %vm95_vm1, %v2910_v61 }
 0xb08   :  { %v1320_v3 = vpop.permute.xlu0 %1319 }
 0xb3f   :  { %v1192_v1 = vpop.permute.xlu2 %1191 }
 0xb40   :  { %2388 = vmatpush.xpose.msk.msrb.mxu1 %vm95_vm1, %v1192_v1 }
 0xb43   :  { %2389 = vmatmul.msk.f32.vlgmr.msrb.gmra.mxu1 %vm95_vm1, %v2918_v63 }
 0xb44   :  { %2392 = vmatpush.xpose.msk.msra.mxu1 %vm95_vm1, %v1322_v2 }
 0xb4b   :  { %2393 = vmatmul.msk.f32.vlgmr.msra.gmra.mxu1 %vm95_vm1, %v1320_v3 }
 0xb87   :  { %v1187_v7 = vpop.f32.mrf.mxu3 }
 0xb88   :  { %v1217_v8 = vmul.f32 0.35355338, %v1187_v7 }
 0xb8a   :  { %v1219_v10 = vsel %vm95_vm1, %v1217_v8, -inf }
 0xb8b   :  { %1220 = vmax.xlane.f32.xlu1 %v1219_v10 }
 0xbc0   :  { %v1214_v12 = vpop.f32.mrf.mxu1 }
 0xbc1   :  { %v1218_v13 = vmul.f32 0.35355338, %v1214_v12 }
 0xbc3   :  { %v1222_v14 = vsel %vm95_vm1, %v1218_v13, -inf }
 0xbc4   :  { %1223 = vmax.xlane.f32.xlu2 %v1222_v14 }
 0xbc8   :  { %v1344_v15 = vpop.f32.mrf.mxu1 }
 0xbc9   :  { %v1375_v16 = vmul.f32 0.35355338, %v1344_v15 }
 0xbcb   :  { %v1377_v17 = vsel %vm95_vm1, %v1375_v16, -inf }
 0xbcc   :  { %1378 = vmax.xlane.f32.xlu0 %v1377_v17 }
 0xbdc   :  { %2438 = vrot.lane.b32.xlu2 %v2437_v19, %s2567_s21 }
 0xbe0   :  { %1349 = vrot.lane.b32.xlu0 %v2918_v63, %s2564_s19 }
 0xbfe   :  { %v1221_v21 = vpop.xlane.xlu1 %1220 }
 0xbff   :  { %v1225_v23 = vsub.f32 %v1217_v8, %v1221_v21 }
 0xc01   :  { %v1227_v24 = vmul.f32 1.442695, %v1225_v23  ;;  %v2359_v23 = vld [vmem:[%s3182_s2 + $0x20] sm:$0xff] }
 0xc03   :  { %2488 = vpow2.f32 %v1227_v24 }
 0xc09   :  { %v2489_v25 = vpop.eup %2488 }
 0xc0a   :  { %v1231_v26 = vsel %vm95_vm1, %v2489_v25, 0.0 }
 0xc0b   :  { %1232 = vadd.xlane.f32.xlu1 %v1231_v26 }
 0xc24   :  { %1425 = vrot.lane.b32.xlu1 %v2910_v61, %s2569_s23 }
 0xc2c   :  { %1535 = vrot.lane.b32.xlu1 %v2910_v61, %s2568_s22 }
 0xc37   :  { %v1224_v27 = vpop.xlane.xlu2 %1223 }
 0xc38   :  { %v1226_v28 = vsub.f32 %v1218_v13, %v1224_v27 }
 0xc3a   :  { %v1229_v22 = vmul.f32 1.442695, %v1226_v28 }
 0xc3c   :  { %2490 = vpow2.f32 %v1229_v22 }
 0xc3f   :  { %v2439_v29 = vpop.permute.xlu2 %2438  ;;  %v1379_v30 = vpop.xlane.xlu0 %1378 }
 0xc40   :  { %v2441_v31 = vunpack.i.h.bf16 %v2439_v29  ;;  %v2440_v35 = vunpack.i.l.bf16 %v2439_v29  ;;  %v1383_v32 = vsub.f32 %v1375_v16, %v1379_v30 }
 0xc42   :  { %v2491_v33 = vpop.eup %2490  ;;  %v1385_v34 = vmul.f32 1.442695, %v1383_v32  ;;  %1288 = vmatpush.msrb.mxu0 %v2441_v31  ;;  %1314 = vmatpush.msrb.mxu3 %v2440_v35 }
 0xc43   :  { %v1234_v36 = vsel %vm95_vm1, %v2491_v33, 0.0 }
 0xc44   :  { %2492 = vpow2.f32 %v1385_v34  ;;  %1235 = vadd.xlane.f32.xlu2 %v1234_v36 }
 0xc4a   :  { %v2944_v37 = vpop.eup %2492 }
 0xc4b   :  { %v1389_v38 = vsel %vm95_vm1, %v2944_v37, 0.0 }
 0xc4c   :  { %1390 = vadd.xlane.f32.xlu0 %v1389_v38 }
 0xc52   :  { %v1350_v40 = vpop.permute.xlu0 %1349 }
 0xc53   :  { %2394 = vmatpush.xpose.msk.msra.mxu0 %vm95_vm1, %v1350_v40 }
 0xc5c   :  { %1347 = vrot.lane.b32.xlu2 %v2918_v63, %s2566_s0 }
 0xc60   :  { %1537 = vrot.lane.b32.xlu0 %v2910_v61, %s2570_s24 }
 0xc7e   :  { %v1233_v41 = vpop.xlane.xlu1 %1232 }
 0xc7f   :  { %2494 = vrcp.f32 %v1233_v41  ;;  %v1248_v46 = vand.u32 2147483648, %v1233_v41  ;;  %v1246_v18 = vand.u32 2147483647, %v1233_v41  ;;  %vm1242_vm14 = vweird.f32 %v1233_v41 }
 0xc81   :  { %v1249_v43 = vor.u32 1.1754944e-38, %v1248_v46  ;;  %vm1247_vm2 = vcmp.eq.f32.partialorder %v1246_v18, 8.507059e+37 }
 0xc85   :  { %v2495_v42 = vpop.eup %2494 }
 0xc86   :  { %v1238_v44 = vmul.f32 %v2495_v42, %v1233_v41  ;;  %vm1243_vm13 = vweird.f32 %v2495_v42 }
 0xc87   :  { %vm1244_vm15 = vmor %vm1242_vm14, %vm1243_vm13 }
 0xc88   :  { %v1239_v45 = vsub.f32 1.0, %v1238_v44 }
 0xc8a   :  { %v1240_v47 = vmul.f32 %v2495_v42, %v1239_v45 }
 0xc8c   :  { %v1241_v48 = vadd.f32 %v2495_v42, %v1240_v47 }
 0xc8e   :  { %v1245_v49 = vsel %vm1244_vm15, %v2495_v42, %v1241_v48 }
 0xc8f   :  { %v1250_v51 = vsel %vm1247_vm2, %v1249_v43, %v1245_v49 }
 0xc90   :  { %v1251_v4 = vmul.f32 %v2489_v25, %v1250_v51  ;;  %v2360_v25 = vld [vmem:[%s3182_s2 + $0x28] sm:$0xff] }
 0xc91   :  { %1498 = vmatpush.msra.mxu2 %v2360_v25 }
 0xc92   :  { %2390 = vmatmul.msk.f32.vlgmr.msrb.gmra.mxu0 %vm95_vm1, %v1251_v4 }
 0xc93   :  { %1527 = vmatpush.msrb.mxu0 %v2359_v23 }
 0xc96   :  { %v1426_v9 = vpop.permute.xlu1 %1425 }
 0xc97   :  { %1446 = vmatpush.msra.mxu3 %v1426_v9 }
 0xc9e   :  { %v1536_v21 = vpop.permute.xlu1 %1535 }
 0xcb7   :  { %v1236_v6 = vpop.xlane.xlu2 %1235 }
 0xcb8   :  { %2496 = vrcp.f32 %v1236_v6  ;;  %v1263_v56 = vand.u32 2147483648, %v1236_v6  ;;  %v1261_v57 = vand.u32 2147483647, %v1236_v6  ;;  %vm1257_vm4 = vweird.f32 %v1236_v6 }
 0xcba   :  { %v1264_v62 = vor.u32 1.1754944e-38, %v1263_v56  ;;  %vm1262_vm6 = vcmp.eq.f32.partialorder %v1261_v57, 8.507059e+37 }
 0xcbe   :  { %v2497_v39 = vpop.eup %2496 }
 0xcbf   :  { %v1253_v52 = vmul.f32 %v2497_v39, %v1236_v6  ;;  %v1348_v20 = vpop.permute.xlu2 %1347  ;;  %v1391_v54 = vpop.xlane.xlu0 %1390  ;;  %vm1258_vm3 = vweird.f32 %v2497_v39 }
 0xcc0   :  { %2498 = vrcp.f32 %v1391_v54  ;;  %2395 = vmatmul.msk.f32.vlgmr.msra.gmra.mxu0 %vm95_vm1, %v1348_v20  ;;  %vm1259_vm5 = vmor %vm1257_vm4, %vm1258_vm3  ;;  %v1406_v8 = vand.u32 2147483648, %v1391_v54  ;;  %v1404_v12 = vand.u32 2147483647, %v1391_v54  ;;  %vm1400_vm8 = vweird.f32 %v1391_v54 }
 0xcc1   :  { %v1254_v55 = vsub.f32 1.0, %v1253_v52 }
 0xcc2   :  { %v1407_v14 = vor.u32 1.1754944e-38, %v1406_v8  ;;  %vm1405_vm10 = vcmp.eq.f32.partialorder %v1404_v12, 8.507059e+37 }
 0xcc3   :  { %v1255_v5 = vmul.f32 %v2497_v39, %v1254_v55 }
 0xcc5   :  { %v1256_v59 = vadd.f32 %v2497_v39, %v1255_v5 }
 0xcc6   :  { %v2499_v60 = vpop.eup %2498 }
 0xcc7   :  { %v1260_v0 = vsel %vm1259_vm5, %v2497_v39, %v1256_v59  ;;  %v1396_v1 = vmul.f32 %v2499_v60, %v1391_v54  ;;  %vm1401_vm7 = vweird.f32 %v2499_v60 }
 0xcc8   :  { %v1265_v2 = vsel %vm1262_vm6, %v1264_v62, %v1260_v0  ;;  %vm1402_vm9 = vmor %vm1400_vm8, %vm1401_vm7 }
 0xcc9   :  { %v1397_v3 = vsub.f32 1.0, %v1396_v1  ;;  %v1266_v7 = vmul.f32 %v2491_v33, %v1265_v2 }
 0xccb   :  { %v1398_v10 = vmul.f32 %v2499_v60, %v1397_v3  ;;  %2391 = vmatmul.msk.f32.vlgmr.msrb.gmra.mxu3 %vm95_vm1, %v1266_v7 }
 0xccd   :  { %v1399_v13 = vadd.f32 %v2499_v60, %v1398_v10 }
 0xccf   :  { %v1403_v15 = vsel %vm1402_vm9, %v2499_v60, %v1399_v13 }
 0xcd0   :  { %v1408_v16 = vsel %vm1405_vm10, %v1407_v14, %v1403_v15 }
 0xcd1   :  { %v1409_v17 = vmul.f32 %v2944_v37, %v1408_v16 }
 0xcd2   :  { %v1538_v19 = vpop.permute.xlu0 %1537 }
 0xcd3   :  { %2396 = vmatmul.msk.f32.vlgmr.msra.gmra.mxu3 %vm95_vm1, %v1409_v17  ;;  %v2361_v17 = vld [vmem:[%s3182_s2 + $0x30] sm:$0xff] }
 0xcd4   :  { %2402 = vmatpush.xpose.msk.msrb.mxu3 %vm95_vm1, %v1538_v19  ;;  %1714 = vmatpush.msrb.mxu2 %v2361_v17 }
 0xcdb   :  { %2403 = vmatmul.msk.f32.vlgmr.msrb.gmra.mxu3 %vm95_vm1, %v1536_v21 }
 0xd0f   :  { %v1290_v24 = vpop.f32.mrf.mxu0 }
 0xd10   :  { %2400 = vmatmul.msk.f32.vlgmr.msrb.gmra.mxu0 %vm95_vm1, %v1290_v24 }
 0xd3d   :  { %v1372_v26 = vpop.f32.mrf.mxu0 }
 0xd3e   :  { %v1376_v27 = vmul.f32 0.35355338, %v1372_v26 }
 0xd40   :  { %v1380_v28 = vsel %vm95_vm1, %v1376_v27, -inf }
 0xd41   :  { %1381 = vmax.xlane.f32.xlu2 %v1380_v28 }
 0xd4e   :  { %v1316_v22 = vpop.f32.mrf.mxu3 }
 0xd4f   :  { %2401 = vmatmul.msk.f32.gmra.mxu0 %vm95_vm1, %v1316_v22 }
 0xd56   :  { %v1448_v29 = vpop.f32.mrf.mxu3 }
 0xd57   :  { %2398 = vmatmul.msk.f32.vlgmr.msra.gmra.mxu2 %vm95_vm1, %v1448_v29 }
 0xd59   :  { %1563 = vrot.lane.b32.xlu2 %v2918_v63, %s2568_s22 }
 0xd5e   :  { %v1560_v30 = vpop.f32.mrf.mxu3 }
 0xd5f   :  { %v1591_v31 = vmul.f32 0.35355338, %v1560_v30 }
 0xd61   :  { %v1593_v35 = vsel %vm95_vm1, %v1591_v31, -inf }
 0xd62   :  { %1594 = vmax.xlane.f32.xlu0 %v1593_v35 }
 0xd76   :  { %1451 = vrot.lane.b32.xlu0 %v2918_v63, %s2569_s23 }
 0xd7e   :  { %1641 = vrot.lane.b32.xlu0 %v2910_v61, %s2573_s9 }
 0xd86   :  { %1754 = vrot.lane.b32.xlu0 %v2918_v63, %s2571_s29 }
 0xd8d   :  { %v2998_v16 = vpop.f32.mrf.mxu0 }
 0xdb4   :  { %v1382_v32 = vpop.xlane.xlu2 %1381 }
 0xdb5   :  { %v1384_v33 = vsub.f32 %v1376_v27, %v1382_v32 }
 0xdb7   :  { %v1387_v34 = vmul.f32 1.442695, %v1384_v33 }
 0xdb9   :  { %2500 = vpow2.f32 %v1387_v34 }
 0xdbc   :  { %v1564_v56 = vpop.permute.xlu2 %1563 }
 0xdbf   :  { %v2501_v36 = vpop.eup %2500 }
 0xdc0   :  { %v1392_v37 = vsel %vm95_vm1, %v2501_v36, 0.0 }
 0xdc1   :  { %1393 = vadd.xlane.f32.xlu1 %v1392_v37 }
 0xdcc   :  { %v3004_v24 = vpop.f32.mrf.mxu0 }
 0xdd5   :  { %v1595_v38 = vpop.xlane.xlu0 %1594 }
 0xdd6   :  { %v1599_v40 = vsub.f32 %v1591_v31, %v1595_v38 }
 0xdd8   :  { %v1601_v41 = vmul.f32 1.442695, %v1599_v40 }
 0xdda   :  { %2502 = vpow2.f32 %v1601_v41  ;;  %1565 = vrot.lane.b32.xlu1 %v2918_v63, %s2570_s24 }
 0xde0   :  { %v2503_v42 = vpop.eup %2502 }
 0xde1   :  { %v1605_v44 = vsel %vm95_vm1, %v2503_v42, 0.0 }
 0xde2   :  { %1726 = vrot.lane.b32.xlu1 %v2910_v61, %s2571_s29  ;;  %1606 = vadd.xlane.f32.xlu2 %v1605_v44 }
 0xde8   :  { %v1452_v45 = vpop.permute.xlu0 %1451 }
 0xde9   :  { %1472 = vmatpush.msrb.mxu1 %v1452_v45 }
 0xdea   :  { %1752 = vrot.lane.b32.xlu1 %v2918_v63, %s2572_s30 }
 0xdf0   :  { %v1642_v46 = vpop.permute.xlu0 %1641 }
 0xdf1   :  { %1662 = vmatpush.msra.mxu3 %v1642_v46 }
 0xdf8   :  { %v1755_v47 = vpop.permute.xlu0 %1754 }
 0xdf9   :  { %2412 = vmatpush.xpose.msk.msrb.mxu3 %vm95_vm1, %v1755_v47 }
 0xdfa   :  { %1724 = vrot.lane.b32.xlu2 %v2910_v61, %s2572_s30 }
 0xe34   :  { %v1394_v18 = vpop.xlane.xlu1 %1393 }
 0xe35   :  { %2504 = vrcp.f32 %v1394_v18  ;;  %v1421_v51 = vand.u32 2147483648, %v1394_v18  ;;  %v1419_v9 = vand.u32 2147483647, %v1394_v18  ;;  %vm1415_vm12 = vweird.f32 %v1394_v18 }
 0xe37   :  { %v1422_v39 = vor.u32 1.1754944e-38, %v1421_v51  ;;  %vm1420_vm14 = vcmp.eq.f32.partialorder %v1419_v9, 8.507059e+37 }
 0xe3b   :  { %v2505_v48 = vpop.eup %2504 }
 0xe3c   :  { %v1411_v43 = vmul.f32 %v2505_v48, %v1394_v18  ;;  %vm1416_vm11 = vweird.f32 %v2505_v48 }
 0xe3d   :  { %vm1417_vm13 = vmor %vm1415_vm12, %vm1416_vm11 }
 0xe3e   :  { %v1412_v49 = vsub.f32 1.0, %v1411_v43 }
 0xe40   :  { %v1413_v4 = vmul.f32 %v2505_v48, %v1412_v49 }
 0xe42   :  { %v1414_v6 = vadd.f32 %v2505_v48, %v1413_v4 }
 0xe44   :  { %v1418_v52 = vsel %vm1417_vm13, %v2505_v48, %v1414_v6 }
 0xe45   :  { %v1423_v20 = vsel %vm1420_vm14, %v1422_v39, %v1418_v52 }
 0xe46   :  { %v1424_v54 = vmul.f32 %v2501_v36, %v1423_v20 }
 0xe48   :  { %2397 = vmatmul.msk.f32.vlgmr.msrb.gmra.mxu1 %vm95_vm1, %v1424_v54 }
 0xe4c   :  { %v1566_v55 = vpop.permute.xlu1 %1565 }
 0xe4d   :  { %2404 = vmatpush.xpose.msk.msra.mxu1 %vm95_vm1, %v1566_v55 }
 0xe50   :  { %2405 = vmatmul.msk.f32.vlgmr.msra.gmra.mxu1 %vm95_vm1, %v1564_v56 }
 0xe54   :  { %v1727_v5 = vpop.permute.xlu1 %1726 }
 0xe55   :  { %v1607_v57 = vpop.xlane.xlu2 %1606  ;;  %2410 = vmatpush.xpose.msk.msra.mxu0 %vm95_vm1, %v1727_v5 }
 0xe56   :  { %2506 = vrcp.f32 %v1607_v57  ;;  %v1622_v1 = vand.u32 2147483648, %v1607_v57  ;;  %v1620_v3 = vand.u32 2147483647, %v1607_v57  ;;  %vm1616_vm2 = vweird.f32 %v1607_v57 }
 0xe58   :  { %v1623_v8 = vor.u32 1.1754944e-38, %v1622_v1  ;;  %vm1621_vm4 = vcmp.eq.f32.partialorder %v1620_v3, 8.507059e+37 }
 0xe5c   :  { %v2507_v59 = vpop.eup %2506  ;;  %v1753_v14 = vpop.permute.xlu1 %1752 }
 0xe5d   :  { %v1612_v60 = vmul.f32 %v2507_v59, %v1607_v57  ;;  %v1725_v62 = vpop.permute.xlu2 %1724  ;;  %vm1617_vm15 = vweird.f32 %v2507_v59 }
 0xe5e   :  { %2411 = vmatmul.msk.f32.vlgmr.msra.gmra.mxu0 %vm95_vm1, %v1725_v62  ;;  %vm1618_vm3 = vmor %vm1616_vm2, %vm1617_vm15 }
 0xe5f   :  { %v1613_v0 = vsub.f32 1.0, %v1612_v60 }
 0xe61   :  { %v1614_v2 = vmul.f32 %v2507_v59, %v1613_v0 }
 0xe63   :  { %v1615_v7 = vadd.f32 %v2507_v59, %v1614_v2 }
 0xe65   :  { %v1619_v10 = vsel %vm1618_vm3, %v2507_v59, %v1615_v7 }
 0xe66   :  { %v1624_v12 = vsel %vm1621_vm4, %v1623_v8, %v1619_v10 }
 0xe67   :  { %v1625_v13 = vmul.f32 %v2503_v42, %v1624_v12 }
 0xe69   :  { %2406 = vmatmul.msk.f32.vlgmr.msra.gmra.mxu3 %vm95_vm1, %v1625_v13 }
 0xe71   :  { %2413 = vmatmul.msk.f32.vlgmr.msrb.gmra.mxu3 %vm95_vm1, %v1753_v14 }
 0xec5   :  { %v1474_v15 = vpop.f32.mrf.mxu1 }
 0xec6   :  { %2399 = vmatmul.msk.f32.gmra.mxu2 %vm95_vm1, %v1474_v15 }
 0xecd   :  { %v1588_v19 = vpop.f32.mrf.mxu1 }
 0xece   :  { %v1592_v21 = vmul.f32 0.35355338, %v1588_v19 }
 0xed0   :  { %v1596_v23 = vsel %vm95_vm1, %v1592_v21, -inf }
 0xed1   :  { %1597 = vmax.xlane.f32.xlu0 %v1596_v23 }
 0xedb   :  { %v1749_v25 = vpop.f32.mrf.mxu0 }
 0xedc   :  { %v1780_v26 = vmul.f32 0.35355338, %v1749_v25 }
 0xede   :  { %v1782_v27 = vsel %vm95_vm1, %v1780_v26, -inf }
 0xedf   :  { %1783 = vmax.xlane.f32.xlu2 %v1782_v27 }
 0xeec   :  { %v1664_v28 = vpop.f32.mrf.mxu3 }
 0xeed   :  { %2408 = vmatmul.msk.f32.vlgmr.msrb.gmra.mxu2 %vm95_vm1, %v1664_v28  ;;  %v2362_v28 = vld [vmem:[%s3182_s2 + $0x38] sm:$0xff] }
 0xeee   :  { %1903 = vmatpush.msra.mxu3 %v2362_v28 }
 0xef4   :  { %v1777_v22 = vpop.f32.mrf.mxu3 }
 0xef5   :  { %v1781_v29 = vmul.f32 0.35355338, %v1777_v22 }
 0xef7   :  { %v1785_v30 = vsel %vm95_vm1, %v1781_v29, -inf }
 0xef8   :  { %1786 = vmax.xlane.f32.xlu1 %v1785_v30 }
 0xf44   :  { %v1598_v31 = vpop.xlane.xlu0 %1597 }
 0xf45   :  { %v1600_v35 = vsub.f32 %v1592_v21, %v1598_v31  ;;  %v1500_v31 = vpop.f32.mrf.mxu2 }
 0xf47   :  { %v1603_v32 = vmul.f32 1.442695, %v1600_v35 }
 0xf49   :  { %2508 = vpow2.f32 %v1603_v32 }
 0xf4d   :  { %v1503_v35 = vpop.f32.mrf.mxu2 }
 0xf4f   :  { %v2509_v33 = vpop.eup %2508 }
 0xf50   :  { %v1608_v34 = vsel %vm95_vm1, %v2509_v33, 0.0 }
 0xf51   :  { %1609 = vadd.xlane.f32.xlu0 %v1608_v34 }
 0xf52   :  { %v1784_v36 = vpop.xlane.xlu2 %1783 }
 0xf53   :  { %v1788_v37 = vsub.f32 %v1780_v26, %v1784_v36  ;;  %v1913_v36 = vperm.slane %v2907_v11, 1 }
 0xf55   :  { %v1790_v38 = vmul.f32 1.442695, %v1788_v37 }
 0xf57   :  { %2510 = vpow2.f32 %v1790_v38 }
 0xf5d   :  { %v2511_v40 = vpop.eup %2510 }
 0xf5e   :  { %v1794_v41 = vsel %vm95_vm1, %v2511_v40, 0.0 }
 0xf5f   :  { %1795 = vadd.xlane.f32.xlu2 %v1794_v41 }
 0xf65   :  { %1667 = vrot.lane.b32.xlu0 %v2918_v63, %s2573_s9 }
 0xf6b   :  { %v1787_v42 = vpop.xlane.xlu1 %1786 }
 0xf6c   :  { %v1789_v44 = vsub.f32 %v1781_v29, %v1787_v42 }
 0xf6e   :  { %v1792_v45 = vmul.f32 1.442695, %v1789_v44 }
 0xf70   :  { %2512 = vpow2.f32 %v1792_v45  ;;  %v1716_v32 = vpop.f32.mrf.mxu2  ;;  %v1533_v45 = vadd.f32 %v3004_v24, %v1503_v35  ;;  %v2380_v35 = vld [vmem:[%s3184_s4 + $0xe8] sm:$0xff] }
 0xf76   :  { %v2513_v46 = vpop.eup %2512 }
 0xf77   :  { %1830 = vrot.lane.b32.xlu2 %v2910_v61, %s2574_s12  ;;  %v1797_v47 = vsel %vm95_vm1, %v2513_v46, 0.0 }
 0xf78   :  { %1798 = vadd.xlane.f32.xlu1 %v1797_v47 }
 0xf91   :  { %1856 = vrot.lane.b32.xlu1 %v2918_v63, %s2574_s12 }
 0xfc4   :  { %v1610_v18 = vpop.xlane.xlu0 %1609 }
 0xfc5   :  { %2514 = vrcp.f32 %v1610_v18  ;;  %v1637_v51 = vand.u32 2147483648, %v1610_v18  ;;  %v1635_v9 = vand.u32 2147483647, %v1610_v18  ;;  %vm1631_vm6 = vweird.f32 %v1610_v18 }
 0xfc7   :  { %v1638_v61 = vor.u32 1.1754944e-38, %v1637_v51  ;;  %vm1636_vm8 = vcmp.eq.f32.partialorder %v1635_v9, 8.507059e+37 }
 0xfcb   :  { %v2515_v48 = vpop.eup %2514 }
 0xfcc   :  { %v1627_v43 = vmul.f32 %v2515_v48, %v1610_v18  ;;  %vm1632_vm5 = vweird.f32 %v2515_v48 }
 0xfcd   :  { %vm1633_vm7 = vmor %vm1631_vm6, %vm1632_vm5 }
 0xfce   :  { %v1628_v49 = vsub.f32 1.0, %v1627_v43 }
 0xfd0   :  { %v1629_v4 = vmul.f32 %v2515_v48, %v1628_v49 }
 0xfd2   :  { %v1630_v6 = vadd.f32 %v2515_v48, %v1629_v4  ;;  %v1796_v39 = vpop.xlane.xlu2 %1795 }
 0xfd3   :  { %2516 = vrcp.f32 %v1796_v39  ;;  %v1811_v59 = vand.u32 2147483648, %v1796_v39  ;;  %v1809_v62 = vand.u32 2147483647, %v1796_v39  ;;  %vm1805_vm10 = vweird.f32 %v1796_v39 }
 0xfd4   :  { %v1634_v52 = vsel %vm1633_vm7, %v2515_v48, %v1630_v6 }
 0xfd5   :  { %v1639_v20 = vsel %vm1636_vm8, %v1638_v61, %v1634_v52  ;;  %v1812_v1 = vor.u32 1.1754944e-38, %v1811_v59  ;;  %vm1810_vm12 = vcmp.eq.f32.partialorder %v1809_v62, 8.507059e+37 }
 0xfd6   :  { %v1640_v54 = vmul.f32 %v2509_v33, %v1639_v20  ;;  %v1530_v33 = vadd.f32 %v2998_v16, %v1500_v31  ;;  %v2365_v20 = vld [vmem:[%s3183_s3 + $0x30] sm:$0xff] }
 0xfd7   :  { %v1668_v63 = vpop.permute.xlu0 %1667  ;;  %v2381_v31 = vld [vmem:[%s3184_s4 + $0xf0] sm:$0xff] }
 0xfd8   :  { %1688 = vmatpush.msrb.mxu1 %v1668_v63  ;;  %v1722_v34 = vadd.f32 %v1716_v32, %v1530_v33  ;;  %v2363_v63 = vld [vmem:[%s3183_s3 + $0x20] sm:$0xff]  ;;  %v1968_v32 = vperm.slane %v2907_v11, 2 }
 0xfd9   :  { %v2517_v55 = vpop.eup %2516  ;;  %2407 = vmatmul.msk.f32.vlgmr.msrb.gmra.mxu1 %vm95_vm1, %v1640_v54  ;;  %v2364_v54 = vld [vmem:[%s3183_s3 + $0x28] sm:$0xff]  ;;  %v2379_v33 = vld [vmem:[%s3184_s4 + $0xe0] sm:$0xff] }
 0xfda   :  { %v1801_v56 = vmul.f32 %v2517_v55, %v1796_v39  ;;  %v1831_v5 = vpop.permute.xlu2 %1830  ;;  %vm1806_vm9 = vweird.f32 %v2517_v55 }
 0xfdb   :  { %1851 = vmatpush.msra.mxu1 %v1831_v5  ;;  %vm1807_vm11 = vmor %vm1805_vm10, %vm1806_vm9 }
 0xfdc   :  { %v1802_v57 = vsub.f32 1.0, %v1801_v56 }
 0xfde   :  { %v1803_v60 = vmul.f32 %v2517_v55, %v1802_v57 }
 0xfe0   :  { %v1804_v0 = vadd.f32 %v2517_v55, %v1803_v60 }
 0xfe2   :  { %v1808_v2 = vsel %vm1807_vm11, %v2517_v55, %v1804_v0 }
 0xfe3   :  { %v1813_v3 = vsel %vm1810_vm12, %v1812_v1, %v1808_v2  ;;  %v1962_v2 = vperm.slane %v2907_v11, 4 }
 0xfe4   :  { %v1814_v7 = vmul.f32 %v2511_v40, %v1813_v3 }
 0xfe6   :  { %2414 = vmatmul.msk.f32.vlgmr.msra.gmra.mxu1 %vm95_vm1, %v1814_v7 }
 0xfeb   :  { %v1799_v8 = vpop.xlane.xlu1 %1798 }
 0xfec   :  { %2518 = vrcp.f32 %v1799_v8  ;;  %v1826_v17 = vand.u32 2147483648, %v1799_v8  ;;  %vm1820_vm14 = vweird.f32 %v1799_v8  ;;  %v1824_v19 = vand.u32 2147483647, %v1799_v8 }
 0xfee   :  { %v1827_v23 = vor.u32 1.1754944e-38, %v1826_v17  ;;  %vm1825_vm2 = vcmp.eq.f32.partialorder %v1824_v19, 8.507059e+37 }
 0xff2   :  { %v2519_v10 = vpop.eup %2518 }
 0xff3   :  { %v1816_v12 = vmul.f32 %v2519_v10, %v1799_v8  ;;  %vm1821_vm13 = vweird.f32 %v2519_v10  ;;  %v1965_v8 = vperm.slane %v2907_v11, 5 }
 0xff4   :  { %vm1822_vm15 = vmor %vm1820_vm14, %vm1821_vm13 }
 0xff5   :  { %v1817_v13 = vsub.f32 1.0, %v1816_v12 }
 0xff7   :  { %v1818_v14 = vmul.f32 %v2519_v10, %v1817_v13 }
 0xff9   :  { %v1819_v15 = vadd.f32 %v2519_v10, %v1818_v14 }
 0xffb   :  { %v1823_v21 = vsel %vm1822_vm15, %v2519_v10, %v1819_v15 }
 0xffc   :  { %v1828_v25 = vsel %vm1825_vm2, %v1827_v23, %v1823_v21 }
 0xffd   :  { %v1829_v27 = vmul.f32 %v2513_v46, %v1828_v25 }
0x1003   :  { %v1857_v26 = vpop.permute.xlu1 %1856 }
0x1004   :  { %1877 = vmatpush.msrb.mxu0 %v1857_v26 }
0x1005   :  { %2415 = vmatmul.msk.f32.vlgmr.msrb.gmra.mxu0 %vm95_vm1, %v1829_v27 }
0x1056   :  { %v1690_v22 = vpop.f32.mrf.mxu1 }
0x1057   :  { %2409 = vmatmul.msk.f32.gmra.mxu2 %vm95_vm1, %v1690_v22 }
0x1063   :  { %v1853_v29 = vpop.f32.mrf.mxu1 }
0x1064   :  { %2416 = vmatmul.msk.f32.vlgmr.msra.gmra.mxu3 %vm95_vm1, %v1853_v29 }
0x1082   :  { %v1879_v30 = vpop.f32.mrf.mxu0 }
0x1083   :  { %2417 = vmatmul.msk.f32.gmra.mxu3 %vm95_vm1, %v1879_v30  ;;  %v2382_v30 = vld [vmem:[%s3184_s4 + $0xf8] sm:$0xff] }
0x1084   :  { %2087 = vmatpush.msra.mxu2 %v2382_v30 }
0x1086   :  { %2088 = vmatpush.msra.mxu2 %v2381_v31 }
0x1088   :  { %2089 = vmatpush.msra.mxu2 %v2380_v35 }
0x108a   :  { %2090 = vmatpush.msra.mxu2 %v2379_v33 }
0x10da   :  { %v1719_v44 = vpop.f32.mrf.mxu2 }
0x10db   :  { %v1723_v46 = vadd.f32 %v1719_v44, %v1533_v45  ;;  %v2374_v45 = vld [vmem:[%s3184_s4 + $0xb8] sm:$0xff] }
0x10e7   :  { %v1905_v37 = vpop.f32.mrf.mxu3 }
0x10e8   :  { %v1911_v38 = vadd.f32 %v1905_v37, %v1722_v34  ;;  %v2378_v34 = vld [vmem:[%s3184_s4 + $0xd8] sm:$0xff] }
0x10e9   :  { %2091 = vmatpush.msra.mxu2 %v2378_v34 }
0x10ea   :  { %v1914_v40 = vadd.f32 %v1913_v36, %v1911_v38  ;;  %v2377_v38 = vld [vmem:[%s3184_s4 + $0xd0] sm:$0xff] }
0x10eb   :  { %2092 = vmatpush.msra.mxu2 %v2377_v38 }
0x10ec   :  { %v1916_v41 = vadd.f32 %v1914_v40, %v2895_v50  ;;  %v2376_v40 = vld [vmem:[%s3184_s4 + $0xc8] sm:$0xff] }
0x10ed   :  { %2093 = vmatpush.msra.mxu2 %v2376_v40 }
0x10ee   :  { %v1918_v42 = vsel %vm62_vm0, %v1916_v41, 0.0 }
0x10ef   :  { %1919 = vadd.xlane.f32.xlu0 %v1918_v42  ;;  %v2375_v42 = vld [vmem:[%s3184_s4 + $0xc0] sm:$0xff] }
0x10f0   :  { %2094 = vmatpush.msra.mxu2 %v2375_v42 }
0x10f2   :  { %2095 = vmatpush.msra.mxu2 %v2374_v45 }
0x1106   :  { %v1908_v47 = vpop.f32.mrf.mxu3 }
0x1107   :  { %v1912_v18 = vadd.f32 %v1908_v47, %v1723_v46 }
0x1109   :  { %v1915_v48 = vadd.f32 %v1913_v36, %v1912_v18  ;;  %v2373_v18 = vld [vmem:[%s3184_s4 + $0xb0] sm:$0xff] }
0x110a   :  { %2096 = vmatpush.msra.mxu2 %v2373_v18 }
0x110b   :  { %v1917_v16 = vadd.f32 %v1915_v48, %v2900_v58  ;;  %v2366_v58 = vld [vmem:[%s3183_s3 + $0x38] sm:$0xff]  ;;  %s2306_s3 = sshll.u32 %s2576_s27, 4  ;;  %s2307_s3 = int_to_ptr.vmem [resolvable:$true] %s2306_s3 }
0x110c   :  { %1987 = vmatpush.msrb.mxu1 %v2366_v58  ;;  %v2368_v58 = vld [vmem:[%s3184_s4 + $0x88] sm:$0xff] }
0x110d   :  { %v1921_v43 = vsel %vm62_vm0, %v1917_v16, 0.0 }
0x110e   :  { %1922 = vadd.xlane.f32.xlu2 %v1921_v43  ;;  %1988 = vmatpush.msrb.mxu1 %v2365_v20  ;;  %v2372_v43 = vld [vmem:[%s3184_s4 + $0xa8] sm:$0xff] }
0x110f   :  { %2097 = vmatpush.msra.mxu2 %v2372_v43 }
0x1110   :  { %1989 = vmatpush.msrb.mxu1 %v2364_v54  ;;  %v2367_v54 = vld [vmem:[%s3184_s4 + $0x80] sm:$0xff] }
0x1112   :  { %1990 = vmatpush.msrb.mxu1 %v2363_v63 }
0x1162   :  { %v1920_v49 = vpop.xlane.xlu0 %1919 }
0x1163   :  { %v1924_v51 = vmul.f32 %v1920_v49, %v2779_v53 }
0x1165   :  { %v1926_v4 = vsub.f32 %v1916_v41, %v1924_v51 }
0x1167   :  { %v1928_v50 = vmul.f32 %v1926_v4, %v1926_v4 }
0x1169   :  { %v1930_v9 = vsel %vm62_vm0, %v1928_v50, 0.0 }
0x116a   :  { %1931 = vadd.xlane.f32.xlu1 %v1930_v9 }
0x1181   :  { %v1923_v6 = vpop.xlane.xlu2 %1922 }
0x1182   :  { %v1925_v24 = vmul.f32 %v1923_v6, %v2779_v53  ;;  %v2370_v6 = vld [vmem:[%s3184_s4 + $0x98] sm:$0xff] }
0x1184   :  { %v1927_v39 = vsub.f32 %v1917_v16, %v1925_v24 }
0x1186   :  { %v1929_v61 = vmul.f32 %v1927_v39, %v1927_v39 }
0x1188   :  { %v1933_v52 = vsel %vm62_vm0, %v1929_v61, 0.0 }
0x1189   :  { %1934 = vadd.xlane.f32.xlu0 %v1933_v52 }
0x11dd   :  { %v1932_v55 = vpop.xlane.xlu1 %1931 }
0x11de   :  { %v1936_v56 = vmul.f32 %v1932_v55, %v2779_v53 }
0x11e0   :  { %v1938_v5 = vadd.f32 1e-05, %v1936_v56 }
0x11e2   :  { %2520 = vrsqrt.f32 %v1938_v5  ;;  %vm1946_vm3 = vweird.f32 %v1938_v5 }
0x11e8   :  { %v2521_v57 = vpop.eup %2520 }
0x11e9   :  { %v1941_v59 = vmul.f32 %v2521_v57, %v1938_v5  ;;  %vm1947_vm1 = vweird.f32 %v2521_v57 }
0x11ea   :  { %vm1948_vm4 = vmor %vm1946_vm3, %vm1947_vm1 }
0x11eb   :  { %v1942_v60 = vmul.f32 %v2521_v57, %v1941_v59 }
0x11ed   :  { %v1943_v62 = vmul.f32 0.5, %v1942_v60 }
0x11ef   :  { %v1944_v0 = vsub.f32 1.5, %v1943_v62 }
0x11f1   :  { %v1945_v1 = vmul.f32 %v2521_v57, %v1944_v0 }
0x11f3   :  { %v1949_v3 = vsel %vm1948_vm4, %v2521_v57, %v1945_v1  ;;  %vm2169_vm4 = vcmask 261127  }
0x11f4   :  { %v1960_v7 = vmul.f32 %v1949_v3, %v1926_v4  ;;  %v2371_v4 = vld [vmem:[%s3184_s4 + $0xa0] sm:$0xff] }
0x11f5   :  { %2098 = vmatpush.msra.mxu2 %v2371_v4 }
0x11f6   :  { %v1963_v10 = vmul.f32 %v1962_v2, %v1960_v7 }
0x11f7   :  { %2099 = vmatpush.msra.mxu2 %v2370_v6 }
0x11f8   :  { %v3053_v12 = vadd.f32 %v1965_v8, %v1963_v10 }
0x11fa   :  { %2418 = vmatmul.msk.f32.vlgmr.msrb.gmra.mxu1 %vm62_vm0, %v3053_v12 }
0x11fc   :  { %v1935_v13 = vpop.xlane.xlu0 %1934 }
0x11fd   :  { %v1937_v14 = vmul.f32 %v1935_v13, %v2779_v53 }
0x11ff   :  { %v1939_v15 = vadd.f32 1e-05, %v1937_v14 }
0x1201   :  { %2522 = vrsqrt.f32 %v1939_v15  ;;  %vm1956_vm6 = vweird.f32 %v1939_v15 }
0x1207   :  { %v2523_v17 = vpop.eup %2522 }
0x1208   :  { %v1951_v19 = vmul.f32 %v2523_v17, %v1939_v15  ;;  %vm1957_vm5 = vweird.f32 %v2523_v17 }
0x1209   :  { %vm1958_vm7 = vmor %vm1956_vm6, %vm1957_vm5 }
0x120a   :  { %v1952_v21 = vmul.f32 %v2523_v17, %v1951_v19 }
0x120c   :  { %v1953_v23 = vmul.f32 0.5, %v1952_v21 }
0x120e   :  { %v1954_v25 = vsub.f32 1.5, %v1953_v23 }
0x1210   :  { %v1955_v26 = vmul.f32 %v2523_v17, %v1954_v25 }
0x1212   :  { %v1959_v27 = vsel %vm1958_vm7, %v2523_v17, %v1955_v26 }
0x1213   :  { %v1961_v28 = vmul.f32 %v1959_v27, %v1927_v39  ;;  %v2369_v39 = vld [vmem:[%s3184_s4 + $0x90] sm:$0xff] }
0x1214   :  { %2100 = vmatpush.msra.mxu2 %v2369_v39 }
0x1215   :  { %v1964_v22 = vmul.f32 %v1962_v2, %v1961_v28 }
0x1216   :  { %2101 = vmatpush.msra.mxu2 %v2368_v58 }
0x1217   :  { %v3058_v29 = vadd.f32 %v1965_v8, %v1964_v22 }
0x1218   :  { %2102 = vmatpush.msra.mxu2 %v2367_v54 }
0x1219   :  { %2419 = vmatmul.msk.f32.gmra.mxu1 %vm62_vm0, %v3058_v29 }
0x1277   :  { %v1992_v36 = vpop.f32.mrf.mxu1 }
0x1278   :  { %v3078_v37 = vadd.f32 %v1992_v36, %v1968_v32 }
0x127a   :  { %v2000_v11 = vmul.f32 0.70710677, %v3078_v37  ;;  %v1998_v40 = vmul.f32 0.5, %v3078_v37 }
0x127c   :  { %v2002_v41 = vmul.f32 %v2000_v11, %v2000_v11 }
0x127e   :  { %v2003_v44 = vmin.f32 %v2002_v41, 16.0 }
0x1280   :  { %v2004_v46 = vmul.f32 2.1237322e-06, %v2003_v44  ;;  %v2015_v47 = vmul.f32 3.8918573e-05, %v2003_v44 }
0x1282   :  { %v2005_v48 = vadd.f32 0.00028619796, %v2004_v46  ;;  %v2016_v16 = vadd.f32 0.001143296, %v2015_v47 }
0x1284   :  { %v2006_v49 = vmul.f32 %v2005_v48, %v2003_v44  ;;  %v2017_v51 = vmul.f32 %v2016_v16, %v2003_v44 }
0x1286   :  { %v2007_v50 = vadd.f32 0.0036580483, %v2006_v49  ;;  %v2018_v9 = vadd.f32 0.014752088, %v2017_v51 }
0x1288   :  { %v2019_v24 = vmul.f32 %v2018_v9, %v2003_v44  ;;  %v2008_v61 = vmul.f32 %v2007_v50, %v2003_v44 }
0x128a   :  { %v2020_v52 = vadd.f32 0.112945676, %v2019_v24  ;;  %v2009_v63 = vadd.f32 0.05243302, %v2008_v61 }
0x128c   :  { %v2021_v20 = vmul.f32 %v2020_v52, %v2003_v44  ;;  %v2010_v5 = vmul.f32 %v2009_v63, %v2003_v44 }
0x128e   :  { %v2022_v55 = vadd.f32 0.4994258, %v2021_v20  ;;  %v2011_v59 = vadd.f32 0.18741608, %v2010_v5 }
0x1290   :  { %v2023_v56 = vmul.f32 %v2022_v55, %v2003_v44  ;;  %v2012_v2 = vmul.f32 %v2011_v59, %v2003_v44 }
0x1292   :  { %v2024_v57 = vadd.f32 1.0, %v2023_v56  ;;  %v2013_v13 = vadd.f32 1.1283791, %v2012_v2 }
0x1294   :  { %2524 = vrcp.f32 %v2024_v57  ;;  %v2034_v14 = vand.u32 2147483647, %v2024_v57  ;;  %v2036_v15 = vand.u32 2147483648, %v2024_v57  ;;  %vm2030_vm9 = vweird.f32 %v2024_v57 }
0x1295   :  { %v2014_v27 = vmul.f32 %v2013_v13, %v2000_v11 }
0x1296   :  { %v1995_v60 = vpop.f32.mrf.mxu1  ;;  %v2037_v28 = vor.u32 1.1754944e-38, %v2036_v15  ;;  %vm2035_vm11 = vcmp.eq.f32.partialorder %v2034_v14, 8.507059e+37 }
0x1297   :  { %v3114_v62 = vadd.f32 %v1995_v60, %v1968_v32 }
0x1299   :  { %v2001_v0 = vmul.f32 0.70710677, %v3114_v62  ;;  %v1999_v55 = vmul.f32 0.5, %v3114_v62 }
0x129a   :  { %v2525_v1 = vpop.eup %2524 }
0x129b   :  { %v2026_v3 = vmul.f32 %v2525_v1, %v2024_v57  ;;  %v2042_v7 = vmul.f32 %v2001_v0, %v2001_v0  ;;  %vm2031_vm8 = vweird.f32 %v2525_v1  ;;  %v3122_v57 = vld [vmem:[%s3185_s5 + $0x8] sm:$0xff] }
0x129c   :  { %vm2032_vm10 = vmor %vm2030_vm9, %vm2031_vm8  ;;  %v2086_v59 = vperm.slane %v3122_v57, 3  ;;  %vm2173_vm8 = vcmask 253952  }
0x129d   :  { %v2027_v8 = vsub.f32 1.0, %v2026_v3  ;;  %v2043_v10 = vmin.f32 %v2042_v7, 16.0 }
0x129f   :  { %v2028_v17 = vmul.f32 %v2525_v1, %v2027_v8  ;;  %v2044_v19 = vmul.f32 2.1237322e-06, %v2043_v10  ;;  %v2055_v21 = vmul.f32 3.8918573e-05, %v2043_v10 }
0x12a1   :  { %v2029_v23 = vadd.f32 %v2525_v1, %v2028_v17  ;;  %v2045_v25 = vadd.f32 0.00028619796, %v2044_v19  ;;  %v2056_v26 = vadd.f32 0.001143296, %v2055_v21 }
0x12a3   :  { %v2033_v22 = vsel %vm2032_vm10, %v2525_v1, %v2029_v23  ;;  %v2046_v30 = vmul.f32 %v2045_v25, %v2043_v10  ;;  %v2057_v31 = vmul.f32 %v2056_v26, %v2043_v10 }
0x12a4   :  { %v2038_v35 = vsel %vm2035_vm11, %v2037_v28, %v2033_v22 }
0x12a5   :  { %v2039_v32 = vmul.f32 %v2038_v35, %v2014_v27  ;;  %v2058_v33 = vadd.f32 0.014752088, %v2057_v31  ;;  %v2047_v34 = vadd.f32 0.0036580483, %v2046_v30 }
0x12a7   :  { %v2420_v36 = vclamps-f32 %v2039_v32, 1.0  ;;  %v2059_v38 = vmul.f32 %v2058_v33, %v2043_v10  ;;  %v2048_v44 = vmul.f32 %v2047_v34, %v2043_v10  ;;  %v2156_v33 = vperm.slane %v3122_v57, 6 }
0x12a9   :  { %v2082_v41 = vadd.f32 1.0, %v2420_v36  ;;  %v2060_v42 = vadd.f32 0.112945676, %v2059_v38  ;;  %v2049_v47 = vadd.f32 0.05243302, %v2048_v44  ;;  %v2159_v38 = vperm.slane %v3122_v57, 7 }
0x12ab   :  { %v2084_v45 = vmul.f32 %v2082_v41, %v1998_v40  ;;  %v2061_v46 = vmul.f32 %v2060_v42, %v2043_v10  ;;  %v2050_v16 = vmul.f32 %v2049_v47, %v2043_v10 }
0x12ad   :  { %2103 = vmatmul.f32.vlgmr.msra.gmra.mxu2 %v2084_v45  ;;  %v2062_v11 = vadd.f32 0.4994258, %v2061_v46  ;;  %v2051_v43 = vadd.f32 0.18741608, %v2050_v16 }
0x12af   :  { %v2063_v18 = vmul.f32 %v2062_v11, %v2043_v10  ;;  %v2052_v51 = vmul.f32 %v2051_v43, %v2043_v10 }
0x12b1   :  { %v2064_v48 = vadd.f32 1.0, %v2063_v18  ;;  %v2053_v6 = vadd.f32 1.1283791, %v2052_v51 }
0x12b3   :  { %2526 = vrcp.f32 %v2064_v48  ;;  %v2076_v9 = vand.u32 2147483648, %v2064_v48  ;;  %v2074_v24 = vand.u32 2147483647, %v2064_v48  ;;  %vm2070_vm13 = vweird.f32 %v2064_v48 }
0x12b4   :  { %v2054_v52 = vmul.f32 %v2053_v6, %v2001_v0 }
0x12b5   :  { %v2077_v61 = vor.u32 1.1754944e-38, %v2076_v9  ;;  %vm2075_vm15 = vcmp.eq.f32.partialorder %v2074_v24, 8.507059e+37 }
0x12b9   :  { %v2527_v49 = vpop.eup %2526 }
0x12ba   :  { %v2066_v4 = vmul.f32 %v2527_v49, %v2064_v48  ;;  %vm2071_vm12 = vweird.f32 %v2527_v49 }
0x12bb   :  { %vm2072_vm14 = vmor %vm2070_vm13, %vm2071_vm12 }
0x12bc   :  { %v2067_v50 = vsub.f32 1.0, %v2066_v4 }
0x12be   :  { %v2068_v37 = vmul.f32 %v2527_v49, %v2067_v50 }
0x12c0   :  { %v2069_v39 = vadd.f32 %v2527_v49, %v2068_v37 }
0x12c2   :  { %v2073_v58 = vsel %vm2072_vm14, %v2527_v49, %v2069_v39 }
0x12c3   :  { %v2078_v20 = vsel %vm2075_vm15, %v2077_v61, %v2073_v58  ;;  %vm2250_vm15 = vcmask 1041409  }
0x12c4   :  { %v2079_v54 = vmul.f32 %v2078_v20, %v2054_v52 }
0x12c6   :  { %v2421_v63 = vclamps-f32 %v2079_v54, 1.0 }
0x12c8   :  { %v2083_v56 = vadd.f32 1.0, %v2421_v63 }
0x12ca   :  { %v2085_v5 = vmul.f32 %v2083_v56, %v1999_v55 }
0x12cc   :  { %2106 = vmatmul.f32.gmra.mxu2 %v2085_v5 }
0x1330   :  { %v2104_v60 = vpop.f32.mrf.mxu2 }
0x1331   :  { %v2105_v1 = vadd.f32 %v2104_v60, %v2086_v59 }
0x1333   :  { %v2110_v0 = vadd.f32 %v2105_v1, %v3053_v12 }
0x1335   :  { %v2112_v2 = vsel %vm62_vm0, %v2110_v0, 0.0 }
0x1336   :  { %2113 = vadd.xlane.f32.xlu0 %v2112_v2  ;;  %v2240_v2 = vld [vmem:[%s3186_s6 + $0x20] sm:$0xff] }
0x134f   :  { %v2107_v3 = vpop.f32.mrf.mxu2 }
0x1350   :  { %v2108_v7 = vadd.f32 %v2107_v3, %v2086_v59  ;;  %v2238_v3 = vld [vmem:[%s3186_s6 + $0x10] sm:$0xff] }
0x1352   :  { %v2111_v62 = vadd.f32 %v2108_v7, %v3058_v29 }
0x1354   :  { %v2115_v8 = vsel %vm62_vm0, %v2111_v62, 0.0 }
0x1355   :  { %2116 = vadd.xlane.f32.xlu2 %v2115_v8 }
0x13a9   :  { %v2114_v10 = vpop.xlane.xlu0 %2113 }
0x13aa   :  { %v2118_v13 = vmul.f32 %v2114_v10, %v2779_v53 }
0x13ac   :  { %v2120_v14 = vsub.f32 %v2110_v0, %v2118_v13  ;;  %v2242_v0 = vld [vmem:[%s3186_s6 + $0x30] sm:$0xff] }
0x13ad   :  { %2266 = vmatpush.msra.mxu0 %v2242_v0 }
0x13ae   :  { %v2122_v15 = vmul.f32 %v2120_v14, %v2120_v14 }
0x13af   :  { %2267 = vmatpush.msra.mxu0 %v2240_v2 }
0x13b0   :  { %v2124_v17 = vsel %vm62_vm0, %v2122_v15, 0.0  ;;  %v2241_v15 = vld [vmem:[%s3186_s6 + $0x28] sm:$0xff] }
0x13b1   :  { %2125 = vadd.xlane.f32.xlu2 %v2124_v17  ;;  %2268 = vmatpush.msra.mxu0 %v2238_v3 }
0x13c8   :  { %v2117_v19 = vpop.xlane.xlu2 %2116 }
0x13c9   :  { %v2119_v12 = vmul.f32 %v2117_v19, %v2779_v53 }
0x13cb   :  { %v2121_v21 = vsub.f32 %v2111_v62, %v2119_v12  ;;  %v2236_v62 = vld [vmem:[%s3186_s6] sm:$0xff]  ;;  %v2239_v12 = vld [vmem:[%s3186_s6 + $0x18] sm:$0xff] }
0x13cc   :  { %2269 = vmatpush.msra.mxu0 %v2236_v62 }
0x13cd   :  { %v2123_v23 = vmul.f32 %v2121_v21, %v2121_v21 }
0x13cf   :  { %v2127_v25 = vsel %vm62_vm0, %v2123_v23, 0.0 }
0x13d0   :  { %2128 = vadd.xlane.f32.xlu1 %v2127_v25 }
0x1424   :  { %v2126_v29 = vpop.xlane.xlu2 %2125 }
0x1425   :  { %v2130_v26 = vmul.f32 %v2126_v29, %v2779_v53 }
0x1427   :  { %v2132_v27 = vadd.f32 1e-05, %v2130_v26 }
0x1429   :  { %2528 = vrsqrt.f32 %v2132_v27  ;;  %vm2140_vm1 = vweird.f32 %v2132_v27 }
0x142f   :  { %v2529_v28 = vpop.eup %2528 }
0x1430   :  { %v2135_v22 = vmul.f32 %v2529_v28, %v2132_v27  ;;  %vm2141_vm2 = vweird.f32 %v2529_v28  ;;  %v2162_v27 = vld [vmem:[%s3187_s7] sm:$0xff] }
0x1431   :  { %vm2142_vm3 = vmor %vm2140_vm1, %vm2141_vm2  ;;  %vm2297_vm2 = vcmask 1041408  }
0x1432   :  { %v2136_v30 = vmul.f32 %v2529_v28, %v2135_v22 }
0x1434   :  { %v2137_v31 = vmul.f32 0.5, %v2136_v30 }
0x1436   :  { %v2138_v35 = vsub.f32 1.5, %v2137_v31  ;;  %v2230_v31 = vperm.slane %v2162_v27, 1 }
0x1438   :  { %v2139_v32 = vmul.f32 %v2529_v28, %v2138_v35 }
0x143a   :  { %v2143_v34 = vsel %vm2142_vm3, %v2529_v28, %v2139_v32 }
0x143b   :  { %v2154_v36 = vmul.f32 %v2143_v34, %v2120_v14  ;;  %v2243_v14 = vld [vmem:[%s3186_s6 + $0x38] sm:$0xff] }
0x143c   :  { %2286 = vmatpush.msrb.mxu0 %v2243_v14 }
0x143d   :  { %v2157_v40 = vmul.f32 %v2156_v33, %v2154_v36 }
0x143e   :  { %2287 = vmatpush.msrb.mxu0 %v2241_v15 }
0x143f   :  { %v2160_v41 = vadd.f32 %v2159_v38, %v2157_v40 }
0x1440   :  { %2288 = vmatpush.msrb.mxu0 %v2239_v12 }
0x1441   :  { %v2170_v42 = vsel %vm2169_vm4, %v2160_v41, 0.0 }
0x1442   :  { %2171 = vadd.xlane.f32.xlu1 %v2170_v42 }
0x1443   :  { %v2129_v44 = vpop.xlane.xlu1 %2128 }
0x1444   :  { %v2131_v45 = vmul.f32 %v2129_v44, %v2779_v53 }
0x1446   :  { %v2133_v46 = vadd.f32 1e-05, %v2131_v45 }
0x1448   :  { %2530 = vrsqrt.f32 %v2133_v46  ;;  %vm2150_vm6 = vweird.f32 %v2133_v46 }
0x144e   :  { %v2531_v11 = vpop.eup %2530 }
0x144f   :  { %v2145_v47 = vmul.f32 %v2531_v11, %v2133_v46  ;;  %vm2151_vm5 = vweird.f32 %v2531_v11 }
0x1450   :  { %vm2152_vm7 = vmor %vm2150_vm6, %vm2151_vm5 }
0x1451   :  { %v2146_v18 = vmul.f32 %v2531_v11, %v2145_v47 }
0x1453   :  { %v2147_v48 = vmul.f32 0.5, %v2146_v18  ;;  %v2163_v18 = vld [vmem:[%s3187_s7 + $0x8] sm:$0xff] }
0x1455   :  { %v2148_v16 = vsub.f32 1.5, %v2147_v48  ;;  %v2245_v48 = vperm.slane %v2163_v18, 0 }
0x1457   :  { %v2149_v43 = vmul.f32 %v2531_v11, %v2148_v16  ;;  %v2244_v16 = vperm.slane %v2162_v27, 0 }
0x1459   :  { %v2153_v49 = vsel %vm2152_vm7, %v2531_v11, %v2149_v43 }
0x145a   :  { %v2155_v51 = vmul.f32 %v2153_v49, %v2121_v21 }
0x145c   :  { %v2158_v4 = vmul.f32 %v2156_v33, %v2155_v51 }
0x145e   :  { %v2161_v50 = vadd.f32 %v2159_v38, %v2158_v4  ;;  %v2233_v38 = vperm.slane %v2162_v27, 2 }
0x1460   :  { %v2166_v9 = vrot.slane %v2161_v50, 7 }
0x1462   :  { %v2174_v6 = vsel %vm2173_vm8, %v2166_v9, 0.0 }
0x1463   :  { %2175 = vadd.xlane.f32.xlu0 %v2174_v6 }
0x14b5   :  { %v2172_v37 = vpop.xlane.xlu1 %2171 }
0x14b6   :  { %v2177_v24 = vmul.f32 %v2172_v37, %v2779_v53 }
0x14b8   :  { %v2184_v39 = vsub.f32 %v2160_v41, %v2177_v24 }
0x14ba   :  { %v2186_v61 = vmul.f32 %v2184_v39, %v2184_v39 }
0x14bc   :  { %v2193_v52 = vsel %vm2169_vm4, %v2186_v61, 0.0 }
0x14bd   :  { %2194 = vadd.xlane.f32.xlu0 %v2193_v52 }
0x14d6   :  { %v2176_v58 = vpop.xlane.xlu0 %2175 }
0x14d7   :  { %v2178_v20 = vmul.f32 %v2176_v58, %v2779_v53 }
0x14d9   :  { %v2181_v54 = vrot.slane %v2178_v20, 1 }
0x14db   :  { %v2185_v63 = vsub.f32 %v2161_v50, %v2181_v54 }
0x14dd   :  { %v2187_v55 = vmul.f32 %v2185_v63, %v2185_v63 }
0x14df   :  { %v2190_v56 = vrot.slane %v2187_v55, 7 }
0x14e1   :  { %v2196_v5 = vsel %vm2173_vm8, %v2190_v56, 0.0 }
0x14e2   :  { %2197 = vadd.xlane.f32.xlu2 %v2196_v5 }
0x1530   :  { %v2195_v57 = vpop.xlane.xlu0 %2194 }
0x1531   :  { %v2199_v59 = vmul.f32 %v2195_v57, %v2779_v53 }
0x1533   :  { %v2201_v60 = vadd.f32 1e-05, %v2199_v59 }
0x1535   :  { %2532 = vrsqrt.f32 %v2201_v60  ;;  %vm2209_vm10 = vweird.f32 %v2201_v60 }
0x153b   :  { %v2533_v1 = vpop.eup %2532 }
0x153c   :  { %v2204_v7 = vmul.f32 %v2533_v1, %v2201_v60  ;;  %vm2210_vm9 = vweird.f32 %v2533_v1 }
0x153d   :  { %vm2211_vm11 = vmor %vm2209_vm10, %vm2210_vm9 }
0x153e   :  { %v2205_v8 = vmul.f32 %v2533_v1, %v2204_v7 }
0x1540   :  { %v2206_v19 = vmul.f32 0.5, %v2205_v8 }
0x1542   :  { %v2207_v21 = vsub.f32 1.5, %v2206_v19 }
0x1544   :  { %v2208_v25 = vmul.f32 %v2533_v1, %v2207_v21 }
0x1546   :  { %v2212_v28 = vsel %vm2211_vm11, %v2533_v1, %v2208_v25 }
0x1547   :  { %v2228_v35 = vmul.f32 %v2212_v28, %v2184_v39 }
0x1549   :  { %v2231_v34 = vmul.f32 %v2230_v31, %v2228_v35 }
0x154b   :  { %v2234_v42 = vadd.f32 %v2233_v38, %v2231_v34 }
0x154d   :  { %v2248_v45 = vrot.slane %v2234_v42, 7 }
0x1555   :  { %v2198_v10 = vpop.xlane.xlu2 %2197 }
0x1556   :  { %v2200_v13 = vmul.f32 %v2198_v10, %v2779_v53  ;;  %v2237_v53 = vld [vmem:[%s3186_s6 + $0x8] sm:$0xff] }
0x1557   :  { %2289 = vmatpush.msrb.mxu0 %v2237_v53 }
0x1558   :  { %v2202_v17 = vadd.f32 1e-05, %v2200_v13 }
0x155a   :  { %2534 = vrsqrt.f32 %v2202_v17  ;;  %vm2219_vm13 = vweird.f32 %v2202_v17 }
0x1560   :  { %v2535_v23 = vpop.eup %2534 }
0x1561   :  { %v2214_v29 = vmul.f32 %v2535_v23, %v2202_v17  ;;  %vm2220_vm12 = vweird.f32 %v2535_v23 }
0x1562   :  { %vm2221_vm14 = vmor %vm2219_vm13, %vm2220_vm12 }
0x1563   :  { %v2215_v26 = vmul.f32 %v2535_v23, %v2214_v29 }
0x1565   :  { %v2216_v22 = vmul.f32 0.5, %v2215_v26 }
0x1567   :  { %v2217_v30 = vsub.f32 1.5, %v2216_v22 }
0x1569   :  { %v2218_v32 = vmul.f32 %v2535_v23, %v2217_v30 }
0x156b   :  { %v2222_v33 = vsel %vm2221_vm14, %v2535_v23, %v2218_v32 }
0x156c   :  { %v2225_v36 = vrot.slane %v2222_v33, 1 }
0x156e   :  { %v2229_v40 = vmul.f32 %v2225_v36, %v2185_v63 }
0x1570   :  { %v2232_v41 = vmul.f32 %v2230_v31, %v2229_v40 }
0x1572   :  { %v2235_v44 = vadd.f32 %v2233_v38, %v2232_v41 }
0x1574   :  { %v2249_v46 = vrot.slane %v2235_v44, 6 }
0x1576   :  { %v2251_v11 = vsel %vm2250_vm15, %v2249_v46, %v2248_v45 }
0x1577   :  { %2422 = vmatmul.msk.f32.vlgmr.msra.gmra.mxu0 %vm62_vm0, %v2251_v11 }
0x157f   :  { %2423 = vmatmul.msk.f32.vlgmr.msrb.gmra.mxu0 %vm62_vm0, %v2251_v11 }
0x15f4   :  { %v2271_v47 = vpop.f32.mrf.mxu0 }
0x15f5   :  { %v2272_v51 = vadd.f32 %v2271_v47, %v2244_v16 }
0x15fc   :  { %v2291_v43 = vpop.f32.mrf.mxu0 }
0x15fd   :  { %v2292_v49 = vadd.f32 %v2291_v43, %v2245_v48 }
0x15ff   :  { %v2296_v4 = vrot.slane %v2292_v49, 6 }
0x1601   :  { %v2298_v50 = vsel %vm2297_vm2, %v2272_v51, %v2296_v4 }
0x1602   :  { %2300 = vst [vmem:[#allocation2] sm:$0xf] %v2298_v50 }
0x1603   :  { %2311 = dma.vmem_to_hbm [thread:$0]  %s2307_s3, 64, %s2309_s11, [#allocation3]  }
0x1604   :  { %2562 = dma.done.wait [#allocation3], 64  }
0x1605   :  { %2563 = vsyncadd [#allocation3], 4294967232 }
0x1606   :  { %2316 = vsyncpa [#allocation3], 1 }

</bundles_post_ra>
